<compile_context>
chip_gen: v7x
topology: tpu7x:2x2x1
jax: 0.10.0
libtpu: 0.0.40
codegen_flags: <defaults>
</compile_context>

<pallas_src>
import functools

import jax
import jax.numpy as jnp
from jax.experimental import pallas as pl
from jax.experimental.pallas import tpu as pltpu

HIGHEST = jax.lax.Precision.HIGHEST


def att_kernel(xq_ref, kt_ref, v_ref, wq_ref, bq_ref, gamma_ref, out_ref,
               q_sc, m_sc, l_sc, acc_sc, *, use_bf16_pv):
    """Flash-style attention for one (batch, q-tile); grid axis 2 walks kv tiles."""
    ki = pl.program_id(2)
    nk = pl.num_programs(2)

    # ---- per-(b, q-tile) init: project q once, reset online-softmax state ----
    @pl.when(ki == 0)
    def _init():
        xq = xq_ref[0]                                                 # (C, TQ)
        q_sc[...] = (jnp.dot(wq_ref[...], xq,
                             preferred_element_type=jnp.float32)
                     + bq_ref[...])                                    # (Cq, TQ)
        m_sc[...] = jnp.full(m_sc.shape, -jnp.inf, jnp.float32)
        l_sc[...] = jnp.zeros(l_sc.shape, jnp.float32)
        acc_sc[...] = jnp.zeros(acc_sc.shape, jnp.float32)

    kt = kt_ref[0]                                                     # (TK, Cq)
    v = v_ref[0]                                                       # (C, TK)

    # energy[j, i] = <k_j, q_i>  -- a standard (TK,Cq)@(Cq,TQ) MXU matmul.
    s = jnp.dot(kt, q_sc[...], preferred_element_type=jnp.float32)     # (TK, TQ)

    # ---- online softmax over kv tiles; state kept as (1, TQ) row vectors ----
    m_prev = m_sc[...]
    m_new = jnp.maximum(m_prev, jnp.max(s, axis=0, keepdims=True))     # (1, TQ)
    alpha = jnp.exp(m_prev - m_new)                                    # (1, TQ)
    p = jnp.exp(s - m_new)                                             # (TK, TQ)
    l_sc[...] = alpha * l_sc[...] + jnp.sum(p, axis=0, keepdims=True)

    if use_bf16_pv:
        # bf16 MXU inputs, f32 accumulation (p in [0,1], v is a projection).
        pv = jnp.dot(v.astype(jnp.bfloat16), p.astype(jnp.bfloat16),
                     preferred_element_type=jnp.float32)               # (C, TQ)
    else:
        pv = jnp.dot(v, p, preferred_element_type=jnp.float32)         # (C, TQ)
    acc_sc[...] = alpha * acc_sc[...] + pv
    m_sc[...] = m_new

    # ---- finalize: normalize, gamma*attn + residual (lane-dense store) ------
    @pl.when(ki == nk - 1)
    def _finalize():
        o = acc_sc[...] / l_sc[...]               # exact softmax normalization
        out_ref[0] = (gamma_ref[0, 0] * o + xq_ref[0]).astype(out_ref.dtype)


def _pick_tile(n, cap):
    t = cap
    while t >= 8:
        if n % t == 0:
            return t
        t //= 2
    return n   # full extent (exempt from the (8,128) rule)


def att_forward(x_nchw, params, *, use_bf16_pv=False, tq_cap=256, tk_cap=256):
    """x_nchw: (B, C, W, H) float32. Returns (B, C, W, H)."""
    B, C, W, H = x_nchw.shape
    N = W * H
    wq, bq, wk, bk, wv, bv, gamma = params
    Cq = wq.shape[0]

    # Native NCHW order -> (B, C, N) is a pure reshape: no transpose pass.
    x_cn = x_nchw.reshape(B, C, N)

    # Hoisted K/V projection: one dense GEMM pass per call instead of a
    # recompute per q-tile inside the kernel.  K comes out in (B, N, Cq)
    # layout, V in lane-dense (B, C, N) layout.
    k_all = (jnp.einsum("dc,bcn->bnd", wk, x_cn, precision=HIGHEST)
             + bk[None, None, :])
    v_all = (jnp.einsum("ec,bcn->ben", wv, x_cn, precision=HIGHEST)
             + bv[None, :, None])

    bq_col = bq.reshape(Cq, 1)
    gamma_sc = jnp.reshape(gamma, (1, 1)).astype(jnp.float32)

    TQ = _pick_tile(N, tq_cap)
    TK = _pick_tile(N, tk_cap)
    grid = (B, N // TQ, N // TK)

    kernel = functools.partial(att_kernel, use_bf16_pv=use_bf16_pv)

    out_cn = pl.pallas_call(
        kernel,
        out_shape=jax.ShapeDtypeStruct((B, C, N), x_cn.dtype),
        grid_spec=pltpu.PrefetchScalarGridSpec(
            num_scalar_prefetch=0,
            grid=grid,
            in_specs=[
                pl.BlockSpec((1, C, TQ), lambda b, qi, ki: (b, 0, qi)),   # x q-tile / residual
                pl.BlockSpec((1, TK, Cq), lambda b, qi, ki: (b, ki, 0)),  # K tile (TK, Cq)
                pl.BlockSpec((1, C, TK), lambda b, qi, ki: (b, 0, ki)),   # V tile (C, TK)
                pl.BlockSpec((Cq, C), lambda b, qi, ki: (0, 0)),          # Wq
                pl.BlockSpec((Cq, 1), lambda b, qi, ki: (0, 0)),          # bq
                pl.BlockSpec(memory_space=pltpu.MemorySpace.SMEM),        # gamma scalar
            ],
            out_specs=pl.BlockSpec((1, C, TQ), lambda b, qi, ki: (b, 0, qi)),
            scratch_shapes=[
                pltpu.VMEM((Cq, TQ), jnp.float32),   # cached q projection
                pltpu.VMEM((1, TQ), jnp.float32),    # running max
                pltpu.VMEM((1, TQ), jnp.float32),    # running denominator
                pltpu.VMEM((C, TQ), jnp.float32),    # running numerator
            ],
        ),
        compiler_params=pltpu.CompilerParams(
            dimension_semantics=("parallel", "parallel", "arbitrary"),
            vmem_limit_bytes=48 * 1024 * 1024,   # conservative for v7x (64 MiB VMEM)
        ),
    )(x_cn, k_all, v_all, wq, bq_col, gamma_sc)

    # (B, C, N) -> NCHW is again a pure reshape.
    return out_cn.reshape(B, C, W, H)


def att_reference(x_nchw, params):
    """Pure-JAX reference mirroring the PyTorch forward exactly (f32, HIGHEST)."""
    B, C, W, H = x_nchw.shape
    N = W * H
    wq, bq, wk, bk, wv, bv, gamma = params
    x_cn = x_nchw.reshape(B, C, N)
    q = jnp.einsum("dc,bcn->bnd", wq, x_cn, precision=HIGHEST) + bq[None, None, :]
    k = jnp.einsum("dc,bcn->bdn", wk, x_cn, precision=HIGHEST) + bk[None, :, None]
    v = jnp.einsum("ec,bcn->ben", wv, x_cn, precision=HIGHEST) + bv[None, :, None]
    energy = jnp.einsum("bnd,bdm->bnm", q, k, precision=HIGHEST)       # (B, N, N)
    attn = jax.nn.softmax(energy, axis=-1)
    out = jnp.einsum("bcn,bmn->bcm", v, attn, precision=HIGHEST)       # (B, C, N)
    return gamma.reshape(()) * out.reshape(B, C, W, H) + x_nchw


def init_params(key, C):
    Cq = max(C // 8, 1)
    k1, k2, k3, k4, k5, k6 = jax.random.split(key, 6)
    scale = 1.0 / jnp.sqrt(C)
    wq = jax.random.normal(k1, (Cq, C), jnp.float32) * scale
    bq = jax.random.normal(k2, (Cq,), jnp.float32) * 0.1
    wk = jax.random.normal(k3, (Cq, C), jnp.float32) * scale
    bk = jax.random.normal(k4, (Cq,), jnp.float32) * 0.1
    wv = jax.random.normal(k5, (C, C), jnp.float32) * scale
    bv = jax.random.normal(k6, (C,), jnp.float32) * 0.1
    # PyTorch inits gamma = 0 (output == input); use 0.5 so the attention path
    # is actually exercised by the check.
    gamma = jnp.array([0.5], jnp.float32)
    return (wq, bq, wk, bk, wv, bv, gamma)


if __name__ == "__main__":
    # N = 1024 -> grid (B, 4, 4): multiple q tiles and kv tiles so the online
    # softmax accumulation path is genuinely exercised.  Cq = C // 8 = 4.
    B, C, W, H = 2, 32, 32, 32
    key = jax.random.PRNGKey(0)
    kx, kp = jax.random.split(key)
    x = jax.random.normal(kx, (B, C, W, H), jnp.float32)
    params = init_params(kp, C)

    ref = att_reference(x, params)

    # Default path: f32 everywhere inside the kernel.  Tolerance leaves room
    # for DEFAULT-precision (bf16-on-MXU) matmul execution when the kernel
    # body runs outside Mosaic (e.g. interpret mode); compiled Mosaic f32
    # matmuls land ~1e-5 from the reference.
    out = jax.block_until_ready(att_forward(x, params))
    assert out.shape == (B, C, W, H)
    err = float(jnp.max(jnp.abs(out - ref)))
    assert jnp.allclose(out, ref, atol=2e-2, rtol=2e-2), f"f32 path max err {err}"

    # Perf-flag path: bf16 inputs to the p@v matmul (f32 accumulation).
    out_bf = jax.block_until_ready(att_forward(x, params, use_bf16_pv=True))
    err_bf = float(jnp.max(jnp.abs(out_bf - ref)))
    assert jnp.allclose(out_bf, ref, atol=5e-2, rtol=5e-2), f"bf16 p@v max err {err_bf}"

    print("KERNEL_OK")
</pallas_src>

<mosaic_0001>
module attributes {stable_mosaic.version = 11 : i64} {
  func.func @att_kernel(%arg0: i32, %arg1: i32, %arg2: i32, %arg3: memref<1x32x256xf32, #tpu.memory_space<vmem>>, %arg4: memref<1x256x4xf32, #tpu.memory_space<vmem>>, %arg5: memref<1x32x256xf32, #tpu.memory_space<vmem>>, %arg6: memref<4x32xf32, #tpu.memory_space<vmem>>, %arg7: memref<4x1xf32, #tpu.memory_space<vmem>>, %arg8: memref<1x1xf32, #tpu.memory_space<smem>>, %arg9: memref<1x32x256xf32, #tpu.memory_space<vmem>>, %arg10: memref<4x256xf32, #tpu.memory_space<vmem>>, %arg11: memref<1x256xf32, #tpu.memory_space<vmem>>, %arg12: memref<1x256xf32, #tpu.memory_space<vmem>>, %arg13: memref<32x256xf32, #tpu.memory_space<vmem>>) attributes {dimension_semantics = [#tpu.dimension_semantics<parallel>, #tpu.dimension_semantics<parallel>, #tpu.dimension_semantics<arbitrary>], iteration_bounds = array<i64: 2, 4, 4>, scalar_prefetch = 0 : i64, scratch_operands = 4 : i64, tpu.core_type = #tpu.core_type<tc>, window_params = [{transform_indices = @transform_0, window_bounds = array<i64: 1, 32, 256>}, {transform_indices = @transform_1, window_bounds = array<i64: 1, 256, 4>}, {transform_indices = @transform_2, window_bounds = array<i64: 1, 32, 256>}, {pipeline_mode = #tpu.pipeline_mode<synchronous>, transform_indices = @transform_3, window_bounds = array<i64: 4, 32>}, {pipeline_mode = #tpu.pipeline_mode<synchronous>, transform_indices = @transform_4, window_bounds = array<i64: 4, 1>}, {transform_indices = @transform_5, window_bounds = array<i64: 1, 1>}, {transform_indices = @transform_6, window_bounds = array<i64: 1, 32, 256>}]} {
    %c0_i32 = arith.constant 0 : i32
    %0 = arith.cmpi eq, %arg2, %c0_i32 : i32
    %1 = arith.extui %0 : i1 to i32
    %c0_i32_0 = arith.constant 0 : i32
    %2 = arith.cmpi ne, %1, %c0_i32_0 : i32
    scf.if %2 {
      %c0_24 = arith.constant 0 : index
      %c0_25 = arith.constant 0 : index
      %c0_26 = arith.constant 0 : index
      %34 = vector.load %arg3[%c0_24, %c0_25, %c0_26] : memref<1x32x256xf32, #tpu.memory_space<vmem>>, vector<1x32x256xf32>
      %35 = vector.shape_cast %34 : vector<1x32x256xf32> to vector<32x256xf32>
      %c0_27 = arith.constant 0 : index
      %c0_28 = arith.constant 0 : index
      %36 = vector.load %arg6[%c0_27, %c0_28] : memref<4x32xf32, #tpu.memory_space<vmem>>, vector<4x32xf32>
      %cst_29 = arith.constant dense<0.000000e+00> : vector<4x256xf32>
      %37 = tpu.matmul %36, %35, %cst_29 {dimension_numbers = #tpu.dot_dimension_numbers<[1], [0], [0], [1], [0, 0, 1, 1], [], []>} : vector<4x32xf32>, vector<32x256xf32>, vector<4x256xf32> -> vector<4x256xf32>
      %c0_30 = arith.constant 0 : index
      %c0_31 = arith.constant 0 : index
      %38 = vector.load %arg7[%c0_30, %c0_31] : memref<4x1xf32, #tpu.memory_space<vmem>>, vector<4x1xf32>
      %39 = vector.broadcast %38 : vector<4x1xf32> to vector<4x256xf32>
      %40 = arith.addf %37, %39 : vector<4x256xf32>
      %c0_32 = arith.constant 0 : index
      %c0_33 = arith.constant 0 : index
      %41 = vector.load %arg10[%c0_32, %c0_33] : memref<4x256xf32, #tpu.memory_space<vmem>>, vector<4x256xf32>
      tpu.vector_store %arg10[%c0_32, %c0_33], %40 {strides = array<i32>} : memref<4x256xf32, #tpu.memory_space<vmem>>, vector<4x256xf32>,
      %cst_34 = arith.constant 0xFF800000 : f32
      %42 = vector.broadcast %cst_34 : f32 to vector<1x256xf32>
      %c0_35 = arith.constant 0 : index
      %c0_36 = arith.constant 0 : index
      %43 = vector.load %arg11[%c0_35, %c0_36] : memref<1x256xf32, #tpu.memory_space<vmem>>, vector<1x256xf32>
      tpu.vector_store %arg11[%c0_35, %c0_36], %42 {strides = array<i32>} : memref<1x256xf32, #tpu.memory_space<vmem>>, vector<1x256xf32>,
      %cst_37 = arith.constant 0.000000e+00 : f32
      %44 = vector.broadcast %cst_37 : f32 to vector<1x256xf32>
      %c0_38 = arith.constant 0 : index
      %c0_39 = arith.constant 0 : index
      %45 = vector.load %arg12[%c0_38, %c0_39] : memref<1x256xf32, #tpu.memory_space<vmem>>, vector<1x256xf32>
      tpu.vector_store %arg12[%c0_38, %c0_39], %44 {strides = array<i32>} : memref<1x256xf32, #tpu.memory_space<vmem>>, vector<1x256xf32>,
      %cst_40 = arith.constant 0.000000e+00 : f32
      %46 = vector.broadcast %cst_40 : f32 to vector<32x256xf32>
      %c0_41 = arith.constant 0 : index
      %c0_42 = arith.constant 0 : index
      %47 = vector.load %arg13[%c0_41, %c0_42] : memref<32x256xf32, #tpu.memory_space<vmem>>, vector<32x256xf32>
      tpu.vector_store %arg13[%c0_41, %c0_42], %46 {strides = array<i32>} : memref<32x256xf32, #tpu.memory_space<vmem>>, vector<32x256xf32>,
    } else {
    }
    %c0 = arith.constant 0 : index
    %c0_1 = arith.constant 0 : index
    %c0_2 = arith.constant 0 : index
    %3 = vector.load %arg4[%c0, %c0_1, %c0_2] : memref<1x256x4xf32, #tpu.memory_space<vmem>>, vector<1x256x4xf32>
    %4 = vector.shape_cast %3 : vector<1x256x4xf32> to vector<256x4xf32>
    %c0_3 = arith.constant 0 : index
    %c0_4 = arith.constant 0 : index
    %c0_5 = arith.constant 0 : index
    %5 = vector.load %arg5[%c0_3, %c0_4, %c0_5] : memref<1x32x256xf32, #tpu.memory_space<vmem>>, vector<1x32x256xf32>
    %6 = vector.shape_cast %5 : vector<1x32x256xf32> to vector<32x256xf32>
    %c0_6 = arith.constant 0 : index
    %c0_7 = arith.constant 0 : index
    %7 = vector.load %arg10[%c0_6, %c0_7] : memref<4x256xf32, #tpu.memory_space<vmem>>, vector<4x256xf32>
    %cst = arith.constant dense<0.000000e+00> : vector<256x256xf32>
    %8 = tpu.matmul %4, %7, %cst {dimension_numbers = #tpu.dot_dimension_numbers<[1], [0], [0], [1], [0, 0, 1, 1], [], []>} : vector<256x4xf32>, vector<4x256xf32>, vector<256x256xf32> -> vector<256x256xf32>
    %c0_8 = arith.constant 0 : index
    %c0_9 = arith.constant 0 : index
    %9 = vector.load %arg11[%c0_8, %c0_9] : memref<1x256xf32, #tpu.memory_space<vmem>>, vector<1x256xf32>
    %cst_10 = arith.constant dense<0xFF800000> : vector<256xf32>
    %10 = vector.multi_reduction <maximumf>, %8, %cst_10 [0] : vector<256x256xf32> to vector<256xf32>
    %11 = vector.shape_cast %10 : vector<256xf32> to vector<1x256xf32>
    %12 = arith.maximumf %9, %11 : vector<1x256xf32>
    %13 = arith.subf %9, %12 : vector<1x256xf32>
    %14 = math.exp %13 : vector<1x256xf32>
    %15 = vector.broadcast %12 : vector<1x256xf32> to vector<256x256xf32>
    %16 = arith.subf %8, %15 : vector<256x256xf32>
    %17 = math.exp %16 : vector<256x256xf32>
    %c0_11 = arith.constant 0 : index
    %c0_12 = arith.constant 0 : index
    %18 = vector.load %arg12[%c0_11, %c0_12] : memref<1x256xf32, #tpu.memory_space<vmem>>, vector<1x256xf32>
    %19 = arith.mulf %14, %18 : vector<1x256xf32>
    %cst_13 = arith.constant dense<0.000000e+00> : vector<256xf32>
    %20 = vector.multi_reduction <add>, %17, %cst_13 [0] : vector<256x256xf32> to vector<256xf32>
    %21 = vector.shape_cast %20 : vector<256xf32> to vector<1x256xf32>
    %22 = arith.addf %19, %21 : vector<1x256xf32>
    %c0_14 = arith.constant 0 : index
    %c0_15 = arith.constant 0 : index
    %23 = vector.load %arg12[%c0_14, %c0_15] : memref<1x256xf32, #tpu.memory_space<vmem>>, vector<1x256xf32>
    tpu.vector_store %arg12[%c0_14, %c0_15], %22 {strides = array<i32>} : memref<1x256xf32, #tpu.memory_space<vmem>>, vector<1x256xf32>,
    %cst_16 = arith.constant dense<0.000000e+00> : vector<32x256xf32>
    %24 = tpu.matmul %6, %17, %cst_16 {dimension_numbers = #tpu.dot_dimension_numbers<[1], [0], [0], [1], [0, 0, 1, 1], [], []>} : vector<32x256xf32>, vector<256x256xf32>, vector<32x256xf32> -> vector<32x256xf32>
    %c0_17 = arith.constant 0 : index
    %c0_18 = arith.constant 0 : index
    %25 = vector.load %arg13[%c0_17, %c0_18] : memref<32x256xf32, #tpu.memory_space<vmem>>, vector<32x256xf32>
    %26 = vector.broadcast %14 : vector<1x256xf32> to vector<32x256xf32>
    %27 = arith.mulf %26, %25 : vector<32x256xf32>
    %28 = arith.addf %27, %24 : vector<32x256xf32>
    %c0_19 = arith.constant 0 : index
    %c0_20 = arith.constant 0 : index
    %29 = vector.load %arg13[%c0_19, %c0_20] : memref<32x256xf32, #tpu.memory_space<vmem>>, vector<32x256xf32>
    tpu.vector_store %arg13[%c0_19, %c0_20], %28 {strides = array<i32>} : memref<32x256xf32, #tpu.memory_space<vmem>>, vector<32x256xf32>,
    %c0_21 = arith.constant 0 : index
    %c0_22 = arith.constant 0 : index
    %30 = vector.load %arg11[%c0_21, %c0_22] : memref<1x256xf32, #tpu.memory_space<vmem>>, vector<1x256xf32>
    tpu.vector_store %arg11[%c0_21, %c0_22], %12 {strides = array<i32>} : memref<1x256xf32, #tpu.memory_space<vmem>>, vector<1x256xf32>,
    %c3_i32 = arith.constant 3 : i32
    %31 = arith.cmpi eq, %arg2, %c3_i32 : i32
    %32 = arith.extui %31 : i1 to i32
    %c0_i32_23 = arith.constant 0 : i32
    %33 = arith.cmpi ne, %32, %c0_i32_23 : i32
    scf.if %33 {
      %c0_24 = arith.constant 0 : index
      %c0_25 = arith.constant 0 : index
      %34 = vector.load %arg13[%c0_24, %c0_25] : memref<32x256xf32, #tpu.memory_space<vmem>>, vector<32x256xf32>
      %c0_26 = arith.constant 0 : index
      %c0_27 = arith.constant 0 : index
      %35 = vector.load %arg12[%c0_26, %c0_27] : memref<1x256xf32, #tpu.memory_space<vmem>>, vector<1x256xf32>
      %36 = vector.broadcast %35 : vector<1x256xf32> to vector<32x256xf32>
      %37 = arith.divf %34, %36 : vector<32x256xf32>
      %c0_28 = arith.constant 0 : index
      %c0_29 = arith.constant 0 : index
      %38 = memref.load %arg8[%c0_28, %c0_29] : memref<1x1xf32, #tpu.memory_space<smem>>
      %39 = vector.broadcast %38 : f32 to vector<32x256xf32>
      %40 = arith.mulf %39, %37 : vector<32x256xf32>
      %c0_30 = arith.constant 0 : index
      %c0_31 = arith.constant 0 : index
      %c0_32 = arith.constant 0 : index
      %41 = vector.load %arg3[%c0_30, %c0_31, %c0_32] : memref<1x32x256xf32, #tpu.memory_space<vmem>>, vector<1x32x256xf32>
      %42 = vector.shape_cast %41 : vector<1x32x256xf32> to vector<32x256xf32>
      %43 = arith.addf %40, %42 : vector<32x256xf32>
      %c0_33 = arith.constant 0 : index
      %c0_34 = arith.constant 0 : index
      %c0_35 = arith.constant 0 : index
      %44 = vector.load %arg9[%c0_33, %c0_34, %c0_35] : memref<1x32x256xf32, #tpu.memory_space<vmem>>, vector<1x32x256xf32>
      %45 = vector.shape_cast %44 : vector<1x32x256xf32> to vector<32x256xf32>
      %46 = vector.shape_cast %43 : vector<32x256xf32> to vector<1x32x256xf32>
      tpu.vector_store %arg9[%c0_33, %c0_34, %c0_35], %46 {strides = array<i32>} : memref<1x32x256xf32, #tpu.memory_space<vmem>>, vector<1x32x256xf32>,
    } else {
    }
    return
  }
  func.func @transform_0(%arg0: i32, %arg1: i32, %arg2: i32) -> (i32, i32, i32) {
    %c0_i32 = arith.constant 0 : i32
    %c0_i32_0 = arith.constant 0 : i32
    return %arg0, %c0_i32, %arg1 : i32, i32, i32
  }
  func.func @transform_1(%arg0: i32, %arg1: i32, %arg2: i32) -> (i32, i32, i32) {
    %c0_i32 = arith.constant 0 : i32
    %c0_i32_0 = arith.constant 0 : i32
    return %arg0, %arg2, %c0_i32 : i32, i32, i32
  }
  func.func @transform_2(%arg0: i32, %arg1: i32, %arg2: i32) -> (i32, i32, i32) {
    %c0_i32 = arith.constant 0 : i32
    %c0_i32_0 = arith.constant 0 : i32
    return %arg0, %c0_i32, %arg2 : i32, i32, i32
  }
  func.func @transform_3(%arg0: i32, %arg1: i32, %arg2: i32) -> (i32, i32) {
    %c0_i32 = arith.constant 0 : i32
    %c0_i32_0 = arith.constant 0 : i32
    %c0_i32_1 = arith.constant 0 : i32
    return %c0_i32, %c0_i32_0 : i32, i32
  }
  func.func @transform_4(%arg0: i32, %arg1: i32, %arg2: i32) -> (i32, i32) {
    %c0_i32 = arith.constant 0 : i32
    %c0_i32_0 = arith.constant 0 : i32
    %c0_i32_1 = arith.constant 0 : i32
    return %c0_i32, %c0_i32_0 : i32, i32
  }
  func.func @transform_5(%arg0: i32, %arg1: i32, %arg2: i32) -> (i32, i32) {
    %c0_i32 = arith.constant 0 : i32
    %c0_i32_0 = arith.constant 0 : i32
    %c0_i32_1 = arith.constant 0 : i32
    return %c0_i32, %c0_i32_0 : i32, i32
  }
  func.func @transform_6(%arg0: i32, %arg1: i32, %arg2: i32) -> (i32, i32, i32) {
    %c0_i32 = arith.constant 0 : i32
    %c0_i32_0 = arith.constant 0 : i32
    return %arg0, %c0_i32, %arg1 : i32, i32, i32
  }
}

</mosaic_0001>

<bundles_post_ra>
// kernel: tpu_custom_call.1
= control target key start
LH: loop header
LB: loop body
LE: loop exit
PB: predicated region body
PF: predicated region fallthrough
CT: control target
= control target key end

     0   :  { %s3187_s0 = inlined_call_operand.vmem [shape: f32[2,32,1024], index: 0, kind: input, shape index: {}]   ;;  %s3188_s1 = inlined_call_operand.vmem [shape: f32[2,1024,4], index: 1, kind: input, shape index: {}]   ;;  %s3189_s2 = inlined_call_operand.vmem [shape: f32[2,32,1024], index: 2, kind: input, shape index: {}]   ;;  %s3190_s3 = inlined_call_operand.vmem [shape: f32[4,32], index: 3, kind: input, shape index: {}]   ;;  %s3191_s4 = inlined_call_operand.vmem [shape: f32[4,1], index: 4, kind: input, shape index: {}]   ;;  %s3192_s5 = inlined_call_operand.<no memory space> [shape: f32[1,1], index: 5, kind: input, shape index: {}]   ;;  %s3193_s6 = inlined_call_operand.hbm [shape: f32[2,32,1024], index: 6, kind: output, shape index: {}]  }
   0x1   :  { %3250 = sst [smem:[#allocation43_spill]] %s3187_s0 }
   0x2   :  { %3251 = sst [smem:[#allocation44_spill]] %s3189_s2 }
   0x3   :  { %3252 = sst [smem:[#allocation45_spill]] %s3193_s6 }
   0x4   :  { %11 = sst [smem:[#allocation6]] %s3192_s5 }
   0x5   :  { %12 = vsyncpa [#allocation10], 0 }
   0x6   :  { %14 = vsyncpa [#allocation10 + $0x1], 0  ;;  %s2225_s23 = smov 0   ;;  %s2227_s24 = smov 0  }
   0x7   :  { %s2229_s25 = smov 0   ;;  %s2231_s26 = smov 0  }
   0x8   :  { %s2233_s27 = smov 0   ;;  %s2235_s28 = smov 0  }
   0x9   :  { %s2237_s29 = smov 0   ;;  %s2239_s30 = smov 0  }
   0xa   :  { %s2241_s7 = smov 0   ;;  %s2243_s5 = smov 0  }
   0xb   :  { %s2245_s8 = smov 0   ;;  %s2247_s9 = smov 0  }
   0xc LB: > { %3253 = sst [smem:[#allocation12_spill]] %s2132_s23  ;;  %s1669_s10 = sadd.s32 4294967295, %s2176_s9   ;;  %s2176_s9 = sphi %s2247_s9, %s20_s9   ;;  %s2172_s8 = sphi %s2245_s8, %s3412_s8   ;;  %s2168_s5 = sphi %s2243_s5, %s3411_s5   ;;  %s2164_s7 = sphi %s2241_s7, %s3410_s7   ;;  %s2160_s30 = sphi %s2239_s30, %s3409_s30   ;;  %s2156_s29 = sphi %s2237_s29, %s3408_s29   ;;  %s2152_s28 = sphi %s2235_s28, %s3407_s28   ;;  %s2148_s27 = sphi %s2233_s27, %s3406_s27   ;;  %s2144_s26 = sphi %s2231_s26, %s3405_s26   ;;  %s2140_s25 = sphi %s2229_s25, %s3404_s25   ;;  %s2136_s24 = sphi %s2227_s24, %s3403_s24   ;;  %s2132_s23 = sphi %s2225_s23, %s3402_s23  }
   0xd   : > { %s1670_s11 = sadd.s32 4294967294, %s2176_s9   ;;  %s32_s12 = sadd.s32 1, %s2164_s7 }
   0xe   : > { %p33_p0 = scmp.ge.s32.totalorder %s32_s12, 4  ;;  %s35_s13 = sadd.s32 1, %s2168_s5 }
   0xf   : > { %s39_s14 = sadd.s32 1, %s2172_s8  ;;  %p55_p1 = scmp.ne.s32.totalorder %s2148_s27, %s2144_s26 }
  0x10   : > { %s3414_s12 = smov (%p33_p0, %s32_s12), 0  ;;  %s3416_s13 = smov (!%p33_p0, %s35_s13), %s2168_s5 }
  0x11   : > { %3254 = sst [smem:[#allocation13_spill]] %s3414_s12  ;;  %s48_s15 = sadd.s32 1, %s2148_s27 }
  0x12   : > { %p56_p2 = scmp.eq.s32.totalorder %s2176_s9, 0  ;;  %p37_p3 = scmp.ge.s32.totalorder %s3416_s13, 4 }
  0x13   : > { %s100_s16 = ssub.s32 %s2164_s7, %s3414_s12  ;;  %p111_p5 = scmp.ne.s32.totalorder %s2140_s25, %s2136_s24 }
  0x14   : > { %p2302_p4 = por %p56_p2, %p55_p1  ;;  %s3418_s13 = smov (%p37_p3, %s3416_s13), 0 }
  0x15   : > { %3256 = sst [smem:[#allocation14_spill]] %s3418_s13  ;;  %s3420_s14 = smov (!%p37_p3, %s39_s14), %s2172_s8 }
  0x16   : > { %s44_s18 = ssub.s32 %s2168_s5, %s3418_s13  ;;  %p2313_p6 = por %p111_p5, %p56_p2 }
  0x17   : > { %p41_p7 = scmp.ge.s32.totalorder %s3420_s14, 2  ;;  %p206_p8 = scmp.eq.s32.totalorder %s1669_s10, 31 }
  0x18   : > { %p211_p9 = scmp.ne.s32.totalorder %s2144_s26, %s2132_s23  ;;  %p212_p10 = scmp.eq.s32.totalorder %s1670_s11, 31 }
  0x19   : > { %s3422_s14 = smov (%p41_p7, %s3420_s14), 0  ;;  %p2324_p11 = por %p206_p8, %p55_p1 }
  0x1a   : > { %3258 = sst [smem:[#allocation15_spill]] %s3422_s14  ;;  %p2328_p12 = por %p212_p10, %p211_p9 }
  0x1b   : > { %s43_s22 = ssub.s32 %s2172_s8, %s3422_s14  ;;  %s104_s13 = sadd.s32 1, %s2140_s25 }
  0x1c   : > { %s3260_s21 = scalar_select %p2328_p12, 1, 0 }
  0x1d   : > { %s45_s12 = sor.u32 %s44_s18, %s43_s22  ;;  %s101_s6 = sor.u32 %s100_s16, %s43_s22 }
  0x1e   : > { %3261 = sst [smem:[#allocation16_spill]] %s3260_s21  ;;  %p46_p13 = scmp.eq.s32.totalorder %s45_s12, 0 }
  0x1f   : > { %p102_p0 = scmp.eq.s32.totalorder %s101_s6, 0  ;;  %p1672_p2 = scmp.ge.s32.totalorder %s2176_s9, 32 }
  0x20   : > { %s2336_s10 = scalar_select %p46_p13, %s2148_s27, %s48_s15  }
  0x21   : > { %s2339_s11 = scalar_select %p102_p0, %s2140_s25, %s104_s13  }
  0x22   : > { %237 = sbr.rel (%p1672_p2) target bundleno = 69 (0x45), region = 28 }
  0x29   : > { %240 = sbr.rel (!%p2302_p4) target bundleno = 55 (0x37), region = 32  ;;  %s242_s21 = sand.u32 (%p2302_p4), 1, %s2148_s27  }
  0x2a   : > { %s1674_s14 = sshll.u32 (%p2302_p4), %s2168_s5, 1  ;;  %s1673_s23 = sshll.u32 (%p2302_p4), %s242_s21, 6 }
  0x2b   : > { %s1675_s18 = sshll.u32 (%p2302_p4), %s2172_s8, 5  ;;  %s3262_s0 = sld [smem:[#allocation43_spill]] (%p2302_p4) }
  0x2c   : > { %s247_s16 = sadd.s32 (%p2302_p4), %s1675_s18, %s1674_s14  ;;  %s244_s22 = scalar_lea.vmem (%p2302_p4), [#allocation7], %s1673_s23 }
  0x2d   : > { %s1676_s12 = sshll.u32 (%p2302_p4), %s247_s16, 3 }
  0x31   : > { %s249_s13 = scalar_lea.vmem %s3262_s0, %s1676_s12 }
  0x32   : > { %v262_v0 = vld [vmem:[%s249_s13] sm:$0xff]  ;;  %v264_v1 = vld [vmem:[%s249_s13 + $0x8] sm:$0xff] }
  0x33   : > { %v266_v2 = vld [vmem:[%s249_s13 + $0x40] sm:$0xff]  ;;  %263 = vst [vmem:[%s244_s22] sm:$0xff] %v262_v0  ;;  %265 = vst [vmem:[%s244_s22 + $0x8] sm:$0xff] %v264_v1  ;;  %v268_v3 = vld [vmem:[%s249_s13 + $0x48] sm:$0xff] }
  0x34   : > { %267 = vst [vmem:[%s244_s22 + $0x10] sm:$0xff] %v266_v2  ;;  %v270_v4 = vld [vmem:[%s249_s13 + $0x80] sm:$0xff]  ;;  %v272_v5 = vld [vmem:[%s249_s13 + $0x88] sm:$0xff]  ;;  %269 = vst [vmem:[%s244_s22 + $0x18] sm:$0xff] %v268_v3 }
  0x35   : > { %271 = vst [vmem:[%s244_s22 + $0x20] sm:$0xff] %v270_v4  ;;  %273 = vst [vmem:[%s244_s22 + $0x28] sm:$0xff] %v272_v5  ;;  %v274_v6 = vld [vmem:[%s249_s13 + $0xc0] sm:$0xff]  ;;  %v276_v7 = vld [vmem:[%s249_s13 + $0xc8] sm:$0xff] }
  0x36   : > { %275 = vst [vmem:[%s244_s22 + $0x30] sm:$0xff] %v274_v6  ;;  %277 = vst [vmem:[%s244_s22 + $0x38] sm:$0xff] %v276_v7 }
  0x37 PF: > { %296 = sbr.rel (!%p2313_p6) target bundleno = 69 (0x45), region = 59  ;;  %s298_s23 = sand.u32 (%p2313_p6), 1, %s2140_s25  }
  0x38   : > { %s1678_s14 = sshll.u32 (%p2313_p6), %s2164_s7, 1  ;;  %s1677_s17 = sshll.u32 (%p2313_p6), %s298_s23, 6 }
  0x39   : > { %s1679_s21 = sshll.u32 (%p2313_p6), %s2172_s8, 5  ;;  %s3263_s2 = sld [smem:[#allocation44_spill]] (%p2313_p6) }
  0x3a   : > { %s303_s18 = sadd.s32 (%p2313_p6), %s1679_s21, %s1678_s14  ;;  %s300_s13 = scalar_lea.vmem (%p2313_p6), [#allocation8], %s1677_s17 }
  0x3b   : > { %s1680_s16 = sshll.u32 (%p2313_p6), %s303_s18, 3 }
  0x3f   : > { %s305_s15 = scalar_lea.vmem %s3263_s2, %s1680_s16 }
  0x40   : > { %v318_v8 = vld [vmem:[%s305_s15] sm:$0xff]  ;;  %v320_v9 = vld [vmem:[%s305_s15 + $0x8] sm:$0xff] }
  0x41   : > { %v322_v10 = vld [vmem:[%s305_s15 + $0x40] sm:$0xff]  ;;  %319 = vst [vmem:[%s300_s13] sm:$0xff] %v318_v8  ;;  %321 = vst [vmem:[%s300_s13 + $0x8] sm:$0xff] %v320_v9  ;;  %v324_v11 = vld [vmem:[%s305_s15 + $0x48] sm:$0xff] }
  0x42   : > { %323 = vst [vmem:[%s300_s13 + $0x10] sm:$0xff] %v322_v10  ;;  %v326_v12 = vld [vmem:[%s305_s15 + $0x80] sm:$0xff]  ;;  %v328_v13 = vld [vmem:[%s305_s15 + $0x88] sm:$0xff]  ;;  %325 = vst [vmem:[%s300_s13 + $0x18] sm:$0xff] %v324_v11 }
  0x43   : > { %327 = vst [vmem:[%s300_s13 + $0x20] sm:$0xff] %v326_v12  ;;  %329 = vst [vmem:[%s300_s13 + $0x28] sm:$0xff] %v328_v13  ;;  %v330_v14 = vld [vmem:[%s305_s15 + $0xc0] sm:$0xff]  ;;  %v332_v15 = vld [vmem:[%s305_s15 + $0xc8] sm:$0xff] }
  0x44   : > { %331 = vst [vmem:[%s300_s13 + $0x30] sm:$0xff] %v330_v14  ;;  %333 = vst [vmem:[%s300_s13 + $0x38] sm:$0xff] %v332_v15 }
  0x45 PF: > { %p1681_p1 = scmp.ge.s32.totalorder %s2176_s9, 1  ;;  %p338_p3 = scmp.lt.s32.totalorder %s2176_s9, 33 }
  0x47   : > { %p339_p4 = pnand %p1681_p1, %p338_p3 }
  0x49   : > { %342 = sbr.rel (%p339_p4) target bundleno = 1047 (0x417), region = 82 }
  0x50   : > { %s345_s19 = sand.u32 1, %s2144_s26   ;;  %s352_s22 = sand.u32 1, %s2136_s24  }
  0x51   : > { %s1682_s23 = sshll.u32 %s345_s19, 6  ;;  %s1683_s14 = sshll.u32 %s352_s22, 6 }
  0x52   : > { %s1685_s17 = sshll.u32 %s2152_s28, 5  ;;  %p396_p5 = scmp.lt.s32.totalorder %s2160_s30, 1 }
  0x53   : > { %p398_p6 = scmp.lt.s32.totalorder %s1685_s17, 127  ;;  %s2372_s0 = scalar_lea.vmem [#allocation7], %s1682_s23 }
  0x54   : > { %s397_s21 = scalar_select %p396_p5, %s2160_s30, 1 }
  0x55   : > { %s3424_s17 = smov (!%p398_p6, %s1685_s17), 127  ;;  %s2374_s2 = scalar_lea.vmem [#allocation8], %s1683_s14 }
  0x56   : > { %s1686_s18 = sshll.u32 %s397_s21, 7  ;;  %s2376_s24 = scalar_lea.vmem [#allocation9], %s1682_s23 }
  0x57   : > { %s401_s16 = sadd.s32 %s1686_s18, %s3424_s17  ;;  %p1688_p7 = scmp.ne.s32.totalorder %s2152_s28, 0 }
  0x58   : > { %s1687_s12 = sshll.u32 %s401_s16, 3  ;;  %v412_v16 = vld [vmem:[%s2372_s0 + $0x8] sm:$0xff] (!%p1688_p7)  ;;  %v414_v17 = vld [vmem:[%s2372_s0 + $0x18] sm:$0xff] (!%p1688_p7)  ;;  %v411_v18 = vld [vmem:[%s2372_s0] sm:$0xff] (!%p1688_p7)  ;;  %v506_v19 = vlaneseq (!%p1688_p7)  ;;  %v2178_v24 = vmov (!%p1688_p7), 0.0   ;;  %v2179_v29 = vmov (!%p1688_p7), 0  }
  0x59   : > { %s2370_s13 = scalar_lea.vmem %s3188_s1, %s1687_s12  ;;  %410 = sbr.rel (%p1688_p7) target bundleno = 317 (0x13d), region = 94  ;;  %v1731_v20 = vpack.c.bf16 (!%p1688_p7), %v414_v17, %v412_v16  ;;  %v413_v21 = vld [vmem:[%s2372_s0 + $0x10] sm:$0xff] (!%p1688_p7)  ;;  %v416_v22 = vld [vmem:[%s2372_s0 + $0x28] sm:$0xff] (!%p1688_p7)  ;;  %v418_v23 = vld [vmem:[%s2372_s0 + $0x38] sm:$0xff] (!%p1688_p7)  ;;  %494 = vmatprep.mubr.f32.mxu0 (!%p1688_p7), %v2178_v24  ;;  %512 = vst [vmem:[#allocation5] sm:$0xff] (!%p1688_p7), %v2178_v24  ;;  %1914 = vset.pattern.permute.xlu0 (!%p1688_p7), %v2179_v29  ;;  %v2180_v30 = vmov (!%p1688_p7), -inf  }
  0x5a   : > { %513 = vst [vmem:[#allocation5 + $0x8] sm:$0xff] (!%p1688_p7), %v2178_v24  ;;  %514 = vst [vmem:[#allocation5 + $0x10] sm:$0xff] (!%p1688_p7), %v2178_v24  ;;  %v1733_v25 = vpack.c.bf16 (!%p1688_p7), %v413_v21, %v411_v18  ;;  %v1735_v26 = vpack.c.bf16 (!%p1688_p7), %v418_v23, %v416_v22  ;;  %v415_v27 = vld [vmem:[%s2372_s0 + $0x20] sm:$0xff] (!%p1688_p7)  ;;  %v417_v28 = vld [vmem:[%s2372_s0 + $0x30] sm:$0xff] (!%p1688_p7)  ;;  %vm508_vm0 = vcmp.lt.s32.totalorder (!%p1688_p7), %v506_v19, 256  ;;  %vm426_vm1 = vcmask (!%p1688_p7), 261120  }
  0x5b   : > { %515 = vst [vmem:[#allocation5 + $0x18] sm:$0xff] (!%p1688_p7), %v2178_v24  ;;  %516 = vst [vmem:[#allocation5 + $0x20] sm:$0xff] (!%p1688_p7), %v2178_v24  ;;  %1732 = vmatprep.subr.bf16.mxu0 (!%p1688_p7), %v1731_v20  ;;  %v420_v31 = vld [vmem:[%s3191_s4] sm:$0xf] (!%p1688_p7)  ;;  %v1737_v32 = vpack.c.bf16 (!%p1688_p7), %v417_v28, %v415_v27 }
  0x5c   : > { %517 = vst [vmem:[#allocation5 + $0x28] sm:$0xff] (!%p1688_p7), %v2178_v24  ;;  %518 = vst [vmem:[#allocation5 + $0x30] sm:$0xff] (!%p1688_p7), %v2178_v24  ;;  %1734 = vmatpush1.bf16.msra.mxu0 (!%p1688_p7), %v1733_v25  ;;  %423 = vperm.xlu0 (!%p1688_p7), %1914, %v420_v31   ;;  %v419_v33 = vld [vmem:[%s3190_s3] sm:$0xf] (!%p1688_p7) }
  0x5d   : > { %519 = vst [vmem:[#allocation5 + $0x38] sm:$0xff] (!%p1688_p7), %v2178_v24  ;;  %510 = vst.msk [vmem:[#allocation3] sm:$0x3] (!%p1688_p7), %vm508_vm0, %v2180_v30  ;;  %1736 = vmatprep.subr.bf16.mxu0 (!%p1688_p7), %v1735_v26 }
  0x5e   : > { %511 = vst.msk [vmem:[#allocation4] sm:$0x3] (!%p1688_p7), %vm508_vm0, %v2178_v24 }
  0x60   : > { %1738 = vmatpush1.bf16.msra.mxu0 %v1737_v32 }
  0x63   : > { %1689 = vmatmul.mubr.msk.f32.vlgmr.msra.gmra.mrb[0].mxu0 %vm426_vm1, %v419_v33 }
  0xdb   : > { %v424_v34 = vpop.permute.xlu0 %423 }
 0x136   : > { %v496_v35 = vpop.f32.mrb[0].mxu0 }
 0x137   : > { %v497_v36 = vadd.f32 %v496_v35, %v424_v34  ;;  %v498_v37 = vpop.f32.mrb[1].mxu0 }
 0x138   : > { %v499_v38 = vadd.f32 %v498_v37, %v424_v34 }
 0x13a   : > { %v503_v39 = vcombine.low %v497_v36, %v499_v38 }
 0x13c   : > { %505 = vst [vmem:[#allocation2] sm:$0xff] %v503_v39 }
 0x13d PF: > { %vm660_vm2 = vcmask 1043456   ;;  %v2181_v42 = vmov 0.0   ;;  %v520_v43 = vld [vmem:[%s2370_s13] sm:$0xff]  ;;  %vm563_vm3 = vcmask 31744   ;;  %v521_v44 = vld [vmem:[%s2370_s13 + $0x8] sm:$0xff]  ;;  %v522_v45 = vld [vmem:[%s2370_s13 + $0x10] sm:$0xff] }
 0x13e   : > { %729 = vmatprep.mubr.f32.mxu0 %v2181_v42  ;;  %v523_v46 = vld [vmem:[%s2370_s13 + $0x18] sm:$0xff]  ;;  %v524_v47 = vld [vmem:[%s2370_s13 + $0x20] sm:$0xff]  ;;  %v525_v48 = vld [vmem:[%s2370_s13 + $0x28] sm:$0xff]  ;;  %p1724_p8 = scmp.ne.s32.totalorder %s2152_s28, 3 }
 0x13f   : > { %v526_v49 = vld [vmem:[%s2370_s13 + $0x30] sm:$0xff]  ;;  %v527_v50 = vld [vmem:[%s2370_s13 + $0x38] sm:$0xff]  ;;  %v528_v51 = vld [vmem:[%s2370_s13 + $0x40] sm:$0xff] }
 0x140   : > { %v529_v52 = vld [vmem:[%s2370_s13 + $0x48] sm:$0xff]  ;;  %v530_v53 = vld [vmem:[%s2370_s13 + $0x50] sm:$0xff]  ;;  %v531_v54 = vld [vmem:[%s2370_s13 + $0x58] sm:$0xff] }
 0x141   : > { %v532_v55 = vld [vmem:[%s2370_s13 + $0x60] sm:$0xff]  ;;  %v533_v56 = vld [vmem:[%s2370_s13 + $0x68] sm:$0xff]  ;;  %v534_v57 = vld [vmem:[%s2370_s13 + $0x70] sm:$0xff] }
 0x142   : > { %v535_v58 = vld [vmem:[%s2370_s13 + $0x78] sm:$0xff]  ;;  %v536_v59 = vld [vmem:[%s2370_s13 + $0x80] sm:$0xff]  ;;  %v537_v60 = vld [vmem:[%s2370_s13 + $0x88] sm:$0xff] }
 0x143   : > { %v560_v40 = vld [vmem:[#allocation2] sm:$0xff]  ;;  %v538_v61 = vld [vmem:[%s2370_s13 + $0x90] sm:$0xff]  ;;  %v539_v62 = vld [vmem:[%s2370_s13 + $0x98] sm:$0xff] }
 0x144   : > { %v562_v41 = vcombine.high %v560_v40, %v560_v40  ;;  %v540_v63 = vld [vmem:[%s2370_s13 + $0xa0] sm:$0xff]  ;;  %v541_v0 = vld [vmem:[%s2370_s13 + $0xa8] sm:$0xff]  ;;  %v542_v1 = vld [vmem:[%s2370_s13 + $0xb0] sm:$0xff] }
 0x145   : > { %v543_v2 = vld [vmem:[%s2370_s13 + $0xb8] sm:$0xff]  ;;  %v544_v3 = vld [vmem:[%s2370_s13 + $0xc0] sm:$0xff]  ;;  %v545_v4 = vld [vmem:[%s2370_s13 + $0xc8] sm:$0xff] }
 0x146   : > { %1690 = vmatprep.subr.msk.mxu0 %vm660_vm2, %v562_v41  ;;  %v546_v5 = vld [vmem:[%s2370_s13 + $0xd0] sm:$0xff]  ;;  %v547_v6 = vld [vmem:[%s2370_s13 + $0xd8] sm:$0xff]  ;;  %v548_v7 = vld [vmem:[%s2370_s13 + $0xe0] sm:$0xff] }
 0x147   : > { %1691 = vmatpush1.msk.msra.mxu0 %vm660_vm2, %v560_v40  ;;  %v549_v8 = vld [vmem:[%s2370_s13 + $0xe8] sm:$0xff]  ;;  %v550_v9 = vld [vmem:[%s2370_s13 + $0xf0] sm:$0xff]  ;;  %v551_v10 = vld [vmem:[%s2370_s13 + $0xf8] sm:$0xff] }
 0x148   : > { %1692 = vmatmul.mubr.msk.f32.vlgmr.msra.gmra.mrb[0].mxu0 %vm563_vm3, %v520_v43 }
 0x149   : > { %735 = vmatprep.mubr.f32.mxu0 %v2181_v42 }
 0x14c   : > { %1693 = vmatmul.mubr.msk.f32.gmra.mrb[2].mxu0 %vm563_vm3, %v521_v44 }
 0x14d   : > { %741 = vmatprep.mubr.f32.mxu0 %v2181_v42 }
 0x150   : > { %1694 = vmatmul.mubr.msk.f32.gmra.mrb[4].mxu0 %vm563_vm3, %v522_v45 }
 0x151   : > { %747 = vmatprep.mubr.f32.mxu0 %v2181_v42 }
 0x154   : > { %1695 = vmatmul.mubr.msk.f32.gmra.mrb[6].mxu0 %vm563_vm3, %v523_v46 }
 0x155   : > { %753 = vmatprep.mubr.f32.mxu0 %v2181_v42 }
 0x158   : > { %1696 = vmatmul.mubr.msk.f32.gmra.mrb[8].mxu0 %vm563_vm3, %v524_v47 }
 0x159   : > { %759 = vmatprep.mubr.f32.mxu0 %v2181_v42 }
 0x15c   : > { %1697 = vmatmul.mubr.msk.f32.gmra.mrb[10].mxu0 %vm563_vm3, %v525_v48 }
 0x15d   : > { %765 = vmatprep.mubr.f32.mxu0 %v2181_v42 }
 0x160   : > { %1698 = vmatmul.mubr.msk.f32.gmra.mrb[12].mxu0 %vm563_vm3, %v526_v49 }
 0x161   : > { %771 = vmatprep.mubr.f32.mxu0 %v2181_v42 }
 0x164   : > { %1699 = vmatmul.mubr.msk.f32.gmra.mrb[14].mxu0 %vm563_vm3, %v527_v50 }
 0x165   : > { %777 = vmatprep.mubr.f32.mxu0 %v2181_v42 }
 0x168   : > { %1700 = vmatmul.mubr.msk.f32.gmra.mrb[16].mxu0 %vm563_vm3, %v528_v51 }
 0x169   : > { %783 = vmatprep.mubr.f32.mxu0 %v2181_v42 }
 0x16c   : > { %1701 = vmatmul.mubr.msk.f32.gmra.mrb[18].mxu0 %vm563_vm3, %v529_v52 }
 0x16d   : > { %789 = vmatprep.mubr.f32.mxu0 %v2181_v42 }
 0x170   : > { %1702 = vmatmul.mubr.msk.f32.gmra.mrb[20].mxu0 %vm563_vm3, %v530_v53 }
 0x171   : > { %795 = vmatprep.mubr.f32.mxu0 %v2181_v42 }
 0x174   : > { %1703 = vmatmul.mubr.msk.f32.gmra.mrb[22].mxu0 %vm563_vm3, %v531_v54 }
 0x175   : > { %801 = vmatprep.mubr.f32.mxu0 %v2181_v42 }
 0x178   : > { %1704 = vmatmul.mubr.msk.f32.gmra.mrb[24].mxu0 %vm563_vm3, %v532_v55 }
 0x179   : > { %807 = vmatprep.mubr.f32.mxu0 %v2181_v42 }
 0x17c   : > { %1705 = vmatmul.mubr.msk.f32.gmra.mrb[26].mxu0 %vm563_vm3, %v533_v56 }
 0x17d   : > { %813 = vmatprep.mubr.f32.mxu0 %v2181_v42 }
 0x180   : > { %1706 = vmatmul.mubr.msk.f32.gmra.mrb[28].mxu0 %vm563_vm3, %v534_v57 }
 0x181   : > { %819 = vmatprep.mubr.f32.mxu0 %v2181_v42 }
 0x184   : > { %1707 = vmatmul.mubr.msk.f32.gmra.mrb[30].mxu0 %vm563_vm3, %v535_v58 }
 0x185   : > { %825 = vmatprep.mubr.f32.mxu0 %v2181_v42 }
 0x188   : > { %1708 = vmatmul.mubr.msk.f32.gmra.mrb[32].mxu0 %vm563_vm3, %v536_v59 }
 0x189   : > { %831 = vmatprep.mubr.f32.mxu0 %v2181_v42 }
 0x18c   : > { %1709 = vmatmul.mubr.msk.f32.gmra.mrb[34].mxu0 %vm563_vm3, %v537_v60 }
 0x18d   : > { %837 = vmatprep.mubr.f32.mxu0 %v2181_v42 }
 0x190   : > { %1710 = vmatmul.mubr.msk.f32.gmra.mrb[36].mxu0 %vm563_vm3, %v538_v61 }
 0x191   : > { %843 = vmatprep.mubr.f32.mxu0 %v2181_v42 }
 0x194   : > { %1711 = vmatmul.mubr.msk.f32.gmra.mrb[38].mxu0 %vm563_vm3, %v539_v62 }
 0x195   : > { %849 = vmatprep.mubr.f32.mxu0 %v2181_v42 }
 0x198   : > { %1712 = vmatmul.mubr.msk.f32.gmra.mrb[40].mxu0 %vm563_vm3, %v540_v63 }
 0x199   : > { %855 = vmatprep.mubr.f32.mxu0 %v2181_v42 }
 0x19c   : > { %1713 = vmatmul.mubr.msk.f32.gmra.mrb[42].mxu0 %vm563_vm3, %v541_v0 }
 0x19d   : > { %861 = vmatprep.mubr.f32.mxu0 %v2181_v42 }
 0x1a0   : > { %1714 = vmatmul.mubr.msk.f32.gmra.mrb[44].mxu0 %vm563_vm3, %v542_v1 }
 0x1a1   : > { %867 = vmatprep.mubr.f32.mxu0 %v2181_v42 }
 0x1a4   : > { %1715 = vmatmul.mubr.msk.f32.gmra.mrb[46].mxu0 %vm563_vm3, %v543_v2 }
 0x1a5   : > { %873 = vmatprep.mubr.f32.mxu0 %v2181_v42 }
 0x1a8   : > { %1716 = vmatmul.mubr.msk.f32.gmra.mrb[48].mxu0 %vm563_vm3, %v544_v3 }
 0x1a9   : > { %879 = vmatprep.mubr.f32.mxu0 %v2181_v42 }
 0x1ac   : > { %1717 = vmatmul.mubr.msk.f32.gmra.mrb[50].mxu0 %vm563_vm3, %v545_v4 }
 0x1ad   : > { %885 = vmatprep.mubr.f32.mxu0 %v2181_v42 }
 0x1b0   : > { %1718 = vmatmul.mubr.msk.f32.gmra.mrb[52].mxu0 %vm563_vm3, %v546_v5 }
 0x1b1   : > { %891 = vmatprep.mubr.f32.mxu0 %v2181_v42 }
 0x1b4   : > { %1719 = vmatmul.mubr.msk.f32.gmra.mrb[54].mxu0 %vm563_vm3, %v547_v6 }
 0x1b5   : > { %897 = vmatprep.mubr.f32.mxu0 %v2181_v42 }
 0x1b8   : > { %1720 = vmatmul.mubr.msk.f32.gmra.mrb[56].mxu0 %vm563_vm3, %v548_v7 }
 0x1b9   : > { %903 = vmatprep.mubr.f32.mxu0 %v2181_v42 }
 0x1bc   : > { %1721 = vmatmul.mubr.msk.f32.gmra.mrb[58].mxu0 %vm563_vm3, %v549_v8 }
 0x1bd   : > { %909 = vmatprep.mubr.f32.mxu0 %v2181_v42 }
 0x1c0   : > { %1722 = vmatmul.mubr.msk.f32.gmra.mrb[60].mxu0 %vm563_vm3, %v550_v9 }
 0x1c1   : > { %915 = vmatprep.mubr.f32.mxu0 %v2181_v42 }
 0x1c4   : > { %1723 = vmatmul.mubr.msk.f32.gmra.mrb[62].mxu0 %vm563_vm3, %v551_v10 }
 0x21b   : > { %v2489_v11 = vpop.f32.mrb[0].mxu0 }
 0x21c   : > { %v2491_v12 = vpop.f32.mrb[1].mxu0 }
 0x21f   : > { %v2493_v13 = vpop.f32.mrb[2].mxu0 }
 0x220   : > { %v2495_v14 = vpop.f32.mrb[3].mxu0 }
 0x223   : > { %v2497_v15 = vpop.f32.mrb[4].mxu0 }
 0x224   : > { %v923_v16 = vmax.f32 %v2489_v11, %v2497_v15  ;;  %v2501_v17 = vpop.f32.mrb[5].mxu0 }
 0x225   : > { %v960_v18 = vmax.f32 %v2491_v12, %v2501_v17 }
 0x227   : > { %v2505_v19 = vpop.f32.mrb[6].mxu0 }
 0x228   : > { %v924_v20 = vmax.f32 %v2493_v13, %v2505_v19  ;;  %v2509_v21 = vpop.f32.mrb[7].mxu0 }
 0x229   : > { %v961_v22 = vmax.f32 %v2495_v14, %v2509_v21 }
 0x22b   : > { %v2513_v23 = vpop.f32.mrb[8].mxu0 }
 0x22c   : > { %v925_v24 = vmax.f32 %v923_v16, %v2513_v23  ;;  %v2516_v25 = vpop.f32.mrb[9].mxu0 }
 0x22d   : > { %v962_v26 = vmax.f32 %v960_v18, %v2516_v25 }
 0x22f   : > { %v2519_v27 = vpop.f32.mrb[10].mxu0 }
 0x230   : > { %v926_v28 = vmax.f32 %v924_v20, %v2519_v27  ;;  %v2522_v29 = vpop.f32.mrb[11].mxu0 }
 0x231   : > { %v963_v30 = vmax.f32 %v961_v22, %v2522_v29 }
 0x233   : > { %v2525_v31 = vpop.f32.mrb[12].mxu0 }
 0x234   : > { %v927_v32 = vmax.f32 %v925_v24, %v2525_v31  ;;  %v2528_v33 = vpop.f32.mrb[13].mxu0 }
 0x235   : > { %v964_v34 = vmax.f32 %v962_v26, %v2528_v33 }
 0x237   : > { %v2531_v35 = vpop.f32.mrb[14].mxu0 }
 0x238   : > { %v928_v36 = vmax.f32 %v926_v28, %v2531_v35  ;;  %v2534_v37 = vpop.f32.mrb[15].mxu0 }
 0x239   : > { %v965_v38 = vmax.f32 %v963_v30, %v2534_v37 }
 0x23b   : > { %v2537_v39 = vpop.f32.mrb[16].mxu0 }
 0x23c   : > { %v929_v40 = vmax.f32 %v927_v32, %v2537_v39  ;;  %v2540_v41 = vpop.f32.mrb[17].mxu0 }
 0x23d   : > { %v966_v42 = vmax.f32 %v964_v34, %v2540_v41 }
 0x23f   : > { %v2543_v43 = vpop.f32.mrb[18].mxu0 }
 0x240   : > { %v930_v44 = vmax.f32 %v928_v36, %v2543_v43  ;;  %v2546_v45 = vpop.f32.mrb[19].mxu0 }
 0x241   : > { %v967_v46 = vmax.f32 %v965_v38, %v2546_v45 }
 0x243   : > { %v2549_v47 = vpop.f32.mrb[20].mxu0 }
 0x244   : > { %v931_v48 = vmax.f32 %v929_v40, %v2549_v47  ;;  %v2552_v49 = vpop.f32.mrb[21].mxu0 }
 0x245   : > { %v968_v50 = vmax.f32 %v966_v42, %v2552_v49 }
 0x247   : > { %v2555_v51 = vpop.f32.mrb[22].mxu0 }
 0x248   : > { %v932_v52 = vmax.f32 %v930_v44, %v2555_v51  ;;  %v2558_v53 = vpop.f32.mrb[23].mxu0 }
 0x249   : > { %v969_v54 = vmax.f32 %v967_v46, %v2558_v53 }
 0x24b   : > { %v2561_v55 = vpop.f32.mrb[24].mxu0 }
 0x24c   : > { %v933_v56 = vmax.f32 %v931_v48, %v2561_v55  ;;  %v2564_v57 = vpop.f32.mrb[25].mxu0 }
 0x24d   : > { %v970_v58 = vmax.f32 %v968_v50, %v2564_v57 }
 0x24f   : > { %v2567_v59 = vpop.f32.mrb[26].mxu0 }
 0x250   : > { %v934_v60 = vmax.f32 %v932_v52, %v2567_v59  ;;  %v2570_v61 = vpop.f32.mrb[27].mxu0 }
 0x251   : > { %v971_v62 = vmax.f32 %v969_v54, %v2570_v61 }
 0x253   : > { %v2573_v63 = vpop.f32.mrb[28].mxu0 }
 0x254   : > { %v935_v0 = vmax.f32 %v933_v56, %v2573_v63  ;;  %v2576_v1 = vpop.f32.mrb[29].mxu0 }
 0x255   : > { %v972_v2 = vmax.f32 %v970_v58, %v2576_v1 }
 0x257   : > { %v2579_v3 = vpop.f32.mrb[30].mxu0 }
 0x258   : > { %v936_v4 = vmax.f32 %v934_v60, %v2579_v3  ;;  %v2582_v5 = vpop.f32.mrb[31].mxu0 }
 0x259   : > { %v973_v6 = vmax.f32 %v971_v62, %v2582_v5 }
 0x25b   : > { %v2585_v7 = vpop.f32.mrb[32].mxu0 }
 0x25c   : > { %v937_v8 = vmax.f32 %v935_v0, %v2585_v7  ;;  %v2588_v9 = vpop.f32.mrb[33].mxu0 }
 0x25d   : > { %v974_v10 = vmax.f32 %v972_v2, %v2588_v9 }
 0x25f   : > { %v2591_v16 = vpop.f32.mrb[34].mxu0 }
 0x260   : > { %v938_v18 = vmax.f32 %v936_v4, %v2591_v16  ;;  %v2594_v20 = vpop.f32.mrb[35].mxu0 }
 0x261   : > { %v975_v22 = vmax.f32 %v973_v6, %v2594_v20 }
 0x263   : > { %v2597_v24 = vpop.f32.mrb[36].mxu0 }
 0x264   : > { %v939_v26 = vmax.f32 %v937_v8, %v2597_v24  ;;  %v2600_v28 = vpop.f32.mrb[37].mxu0 }
 0x265   : > { %v976_v30 = vmax.f32 %v974_v10, %v2600_v28 }
 0x267   : > { %v2603_v32 = vpop.f32.mrb[38].mxu0 }
 0x268   : > { %v940_v34 = vmax.f32 %v938_v18, %v2603_v32  ;;  %v2606_v36 = vpop.f32.mrb[39].mxu0 }
 0x269   : > { %v977_v38 = vmax.f32 %v975_v22, %v2606_v36 }
 0x26b   : > { %v2609_v40 = vpop.f32.mrb[40].mxu0 }
 0x26c   : > { %3264 = vst [vmem:[#allocation17_spill] sm:$0xff] %v2609_v40  ;;  %v941_v42 = vmax.f32 %v939_v26, %v2609_v40  ;;  %v2612_v44 = vpop.f32.mrb[41].mxu0 }
 0x26d   : > { %3265 = vst [vmem:[#allocation18_spill] sm:$0xff] %v2612_v44  ;;  %v978_v46 = vmax.f32 %v976_v30, %v2612_v44 }
 0x26f   : > { %v2615_v48 = vpop.f32.mrb[42].mxu0 }
 0x270   : > { %3266 = vst [vmem:[#allocation19_spill] sm:$0xff] %v2615_v48  ;;  %v942_v50 = vmax.f32 %v940_v34, %v2615_v48  ;;  %v2618_v52 = vpop.f32.mrb[43].mxu0 }
 0x271   : > { %3267 = vst [vmem:[#allocation20_spill] sm:$0xff] %v2618_v52  ;;  %v979_v54 = vmax.f32 %v977_v38, %v2618_v52 }
 0x273   : > { %v2621_v56 = vpop.f32.mrb[44].mxu0 }
 0x274   : > { %3268 = vst [vmem:[#allocation21_spill] sm:$0xff] %v2621_v56  ;;  %v943_v58 = vmax.f32 %v941_v42, %v2621_v56  ;;  %v2624_v60 = vpop.f32.mrb[45].mxu0 }
 0x275   : > { %3269 = vst [vmem:[#allocation22_spill] sm:$0xff] %v2624_v60  ;;  %v980_v62 = vmax.f32 %v978_v46, %v2624_v60  ;;  %v2182_v60 = vmov 1966171168  }
 0x277   : > { %v2627_v0 = vpop.f32.mrb[46].mxu0 }
 0x278   : > { %3270 = vst [vmem:[#allocation23_spill] sm:$0xff] %v2627_v0  ;;  %v944_v2 = vmax.f32 %v942_v50, %v2627_v0  ;;  %v2630_v4 = vpop.f32.mrb[47].mxu0 }
 0x279   : > { %3271 = vst [vmem:[#allocation24_spill] sm:$0xff] %v2630_v4  ;;  %v981_v6 = vmax.f32 %v979_v54, %v2630_v4 }
 0x27b   : > { %v2633_v8 = vpop.f32.mrb[48].mxu0 }
 0x27c   : > { %3272 = vst [vmem:[#allocation25_spill] sm:$0xff] %v2633_v8  ;;  %v945_v10 = vmax.f32 %v943_v58, %v2633_v8  ;;  %v2636_v18 = vpop.f32.mrb[49].mxu0 }
 0x27d   : > { %3273 = vst [vmem:[#allocation26_spill] sm:$0xff] %v2636_v18  ;;  %v982_v22 = vmax.f32 %v980_v62, %v2636_v18 }
 0x27f   : > { %v2639_v26 = vpop.f32.mrb[50].mxu0 }
 0x280   : > { %3274 = vst [vmem:[#allocation27_spill] sm:$0xff] %v2639_v26  ;;  %v946_v30 = vmax.f32 %v944_v2, %v2639_v26  ;;  %v2642_v34 = vpop.f32.mrb[51].mxu0 }
 0x281   : > { %3275 = vst [vmem:[#allocation28_spill] sm:$0xff] %v2642_v34  ;;  %v983_v38 = vmax.f32 %v981_v6, %v2642_v34 }
 0x283   : > { %v2645_v42 = vpop.f32.mrb[52].mxu0 }
 0x284   : > { %3276 = vst [vmem:[#allocation29_spill] sm:$0xff] %v2645_v42  ;;  %v947_v46 = vmax.f32 %v945_v10, %v2645_v42  ;;  %v2648_v50 = vpop.f32.mrb[53].mxu0 }
 0x285   : > { %3277 = vst [vmem:[#allocation30_spill] sm:$0xff] %v2648_v50  ;;  %v984_v54 = vmax.f32 %v982_v22, %v2648_v50 }
 0x287   : > { %v2651_v58 = vpop.f32.mrb[54].mxu0 }
 0x288   : > { %3278 = vst [vmem:[#allocation31_spill] sm:$0xff] %v2651_v58  ;;  %v948_v62 = vmax.f32 %v946_v30, %v2651_v58  ;;  %v2654_v18 = vpop.f32.mrb[55].mxu0 }
 0x289   : > { %3279 = vst [vmem:[#allocation32_spill] sm:$0xff] %v2654_v18  ;;  %v985_v2 = vmax.f32 %v983_v38, %v2654_v18 }
 0x28b   : > { %v2657_v26 = vpop.f32.mrb[56].mxu0 }
 0x28c   : > { %3280 = vst [vmem:[#allocation33_spill] sm:$0xff] %v2657_v26  ;;  %v949_v6 = vmax.f32 %v947_v46, %v2657_v26  ;;  %v2660_v34 = vpop.f32.mrb[57].mxu0 }
 0x28d   : > { %3281 = vst [vmem:[#allocation34_spill] sm:$0xff] %v2660_v34  ;;  %v986_v10 = vmax.f32 %v984_v54, %v2660_v34 }
 0x28f   : > { %v2663_v42 = vpop.f32.mrb[58].mxu0 }
 0x290   : > { %3282 = vst [vmem:[#allocation35_spill] sm:$0xff] %v2663_v42  ;;  %v950_v22 = vmax.f32 %v948_v62, %v2663_v42  ;;  %v2666_v50 = vpop.f32.mrb[59].mxu0 }
 0x291   : > { %3283 = vst [vmem:[#allocation36_spill] sm:$0xff] %v2666_v50  ;;  %v987_v30 = vmax.f32 %v985_v2, %v2666_v50 }
 0x293   : > { %v2669_v58 = vpop.f32.mrb[60].mxu0 }
 0x294   : > { %3284 = vst [vmem:[#allocation37_spill] sm:$0xff] %v2669_v58  ;;  %v951_v38 = vmax.f32 %v949_v6, %v2669_v58  ;;  %v2672_v18 = vpop.f32.mrb[61].mxu0  ;;  %v1001_v6 = vunpack.c.l.s4 %v2182_v60  ;;  %v1003_v58 = vlaneseq }
 0x295   : > { %3285 = vst [vmem:[#allocation38_spill] sm:$0xff] %v2672_v18  ;;  %v988_v46 = vmax.f32 %v986_v10, %v2672_v18 }
 0x296   : > { %v1002_v48 = vunpack.c.0.s8 %v1001_v6  ;;  %vm2690_vm4 = vcmp.lt.s32.totalorder %v1003_v58, 256 }
 0x297   : > { %v2675_v26 = vpop.f32.mrb[62].mxu0 }
 0x298   : > { %3286 = vst [vmem:[#allocation39_spill] sm:$0xff] %v2675_v26  ;;  %v952_v54 = vmax.f32 %v950_v22, %v2675_v26  ;;  %v2678_v34 = vpop.f32.mrb[63].mxu0  ;;  %v1004_v22 = vshrl.u32 %v1003_v58, 7 }
 0x299   : > { %3287 = vst [vmem:[#allocation40_spill] sm:$0xff] %v2678_v34  ;;  %v989_v62 = vmax.f32 %v987_v30, %v2678_v34 }
 0x29a   : > { %v953_v42 = vmax.f32 %v951_v38, %v952_v54  ;;  %v2681_v38 = vsub.s32 %v1002_v48, %v1004_v22  ;;  %v2686_v54 = vsub.s32 0, %v1004_v22 }
 0x29b   : > { %v990_v8 = vmax.f32 %v988_v46, %v989_v62 }
 0x29c   : > { %v954_v4 = vrot.slane %v953_v42, 4  ;;  %3288 = vst [vmem:[#allocation41_spill] sm:$0xff] %v2681_v38 }
 0x29d   : > { %v991_v2 = vrot.slane %v990_v8, 4 }
 0x29e   : > { %v955_v50 = vmax.f32 %v953_v42, %v954_v4  ;;  %v922_v42 = vld [vmem:[#allocation3] sm:$0x3] }
 0x29f   : > { %v992_v0 = vmax.f32 %v990_v8, %v991_v2  ;;  %v553_v8 = vld [vmem:[%s2374_s2 + $0x8] sm:$0xff] }
 0x2a0   : > { %v956_v56 = vrot.slane %v955_v50, 2  ;;  %1386 = vmatprep.mubr.f32.mxu1 %v553_v8 }
 0x2a1   : > { %v993_v10 = vrot.slane %v992_v0, 2 }
 0x2a2   : > { %v957_v18 = vmax.f32 %v955_v50, %v956_v56  ;;  %v2688_v56 = vsub.s32 1, %v1004_v22  ;;  %v3314_v22 = vld [vmem:[#allocation39_spill] sm:$0xff] }
 0x2a3   : > { %v994_v52 = vmax.f32 %v992_v0, %v993_v10  ;;  %v3289_v0 = vmov 0 }
 0x2a4   : > { %v958_v26 = vrot.slane %v957_v18, 1  ;;  %v3290_v0 = vsel %vm2690_vm4, 4294967295, %v3289_v0 }
 0x2a5   : > { %v995_v44 = vrot.slane %v994_v52, 1  ;;  %3291 = vst [vmem:[#allocation42_spill] sm:$0xff] %v3290_v0  ;;  %v3308_v0 = vld [vmem:[#allocation33_spill] sm:$0xff] }
 0x2a6   : > { %v959_v40 = vmax.f32 %v957_v18, %v958_v26 }
 0x2a7   : > { %v996_v30 = vmax.f32 %v994_v52, %v995_v44 }
 0x2a9   : > { %v999_v46 = vcombine.low %v959_v40, %v996_v30  ;;  %v3313_v30 = vld [vmem:[#allocation38_spill] sm:$0xff] }
 0x2ab   : > { %v1006_v4 = vrot.slane %v999_v46, %v2681_v38  ;;  %v3310_v46 = vld [vmem:[#allocation35_spill] sm:$0xff] }
 0x2ad   : > { %v1013_v60 = vrot.slane %v1006_v4, %v2681_v38  ;;  %v3311_v4 = vld [vmem:[#allocation36_spill] sm:$0xff] }
 0x2af   : > { %v1015_v18 = vmax.f32 %v922_v42, %v1013_v60  ;;  %v3293_v60 = vld [vmem:[#allocation18_spill] sm:$0xff] }
 0x2b1   : > { %v1016_v44 = vsub.f32 %v922_v42, %v1015_v18  ;;  %v2695_v48 = vrot.slane %v1015_v18, %v2686_v54  ;;  %v2698_v40 = vrot.slane %v1015_v18, %v2688_v56  ;;  %1454 = vst.msk [vmem:[#allocation3] sm:$0x3] %vm2690_vm4, %v1015_v18  ;;  %v3292_v42 = vld [vmem:[#allocation17_spill] sm:$0xff]  ;;  %v3294_v18 = vld [vmem:[#allocation19_spill] sm:$0xff] }
 0x2b3   : > { %v1017_v10 = vmul.f32 1.442695, %v1016_v44  ;;  %v3295_v44 = vld [vmem:[#allocation20_spill] sm:$0xff]  ;;  %v3315_v2 = vsub.f32 %v2489_v11, %v2695_v48  ;;  %v3316_v62 = vsub.f32 %v2491_v12, %v2698_v40  ;;  %v3317_v50 = vsub.f32 %v2493_v13, %v2695_v48 }
 0x2b4   : > { %v3318_v26 = vsub.f32 %v2495_v14, %v2698_v40  ;;  %v3319_v6 = vsub.f32 %v2497_v15, %v2695_v48  ;;  %v3320_v11 = vsub.f32 %v2501_v17, %v2698_v40  ;;  %v3322_v14 = vsub.f32 %v2509_v21, %v2698_v40 }
 0x2b5   : > { %v1094_v38 = vmul.f32 1.442695, %v3315_v2  ;;  %v1096_v58 = vmul.f32 1.442695, %v3316_v62  ;;  %1916 = vpow2.f32 %v1017_v10  ;;  %v1098_v8 = vmul.f32 1.442695, %v3317_v50 }
 0x2b6   : > { %v1100_v52 = vmul.f32 1.442695, %v3318_v26  ;;  %v1102_v34 = vmul.f32 1.442695, %v3319_v6  ;;  %v1104_v12 = vmul.f32 1.442695, %v3320_v11  ;;  %v3321_v62 = vsub.f32 %v2505_v19, %v2695_v48 }
 0x2b7   : > { %1918 = vpow2.f32 %v1094_v38  ;;  %v1108_v26 = vmul.f32 1.442695, %v3322_v14  ;;  %v3323_v15 = vsub.f32 %v2513_v23, %v2695_v48  ;;  %v3324_v17 = vsub.f32 %v2516_v25, %v2698_v40 }
 0x2b8   : > { %1920 = vpow2.f32 %v1096_v58  ;;  %v1106_v13 = vmul.f32 1.442695, %v3321_v62  ;;  %v3325_v19 = vsub.f32 %v2519_v27, %v2695_v48  ;;  %v3326_v21 = vsub.f32 %v2522_v29, %v2698_v40 }
 0x2b9   : > { %1922 = vpow2.f32 %v1098_v8  ;;  %v1110_v38 = vmul.f32 1.442695, %v3323_v15  ;;  %v1112_v50 = vmul.f32 1.442695, %v3324_v17  ;;  %v3327_v23 = vsub.f32 %v2525_v31, %v2695_v48 }
 0x2ba   : > { %1924 = vpow2.f32 %v1100_v52  ;;  %v1114_v58 = vmul.f32 1.442695, %v3325_v19  ;;  %v1116_v52 = vmul.f32 1.442695, %v3326_v21  ;;  %v3328_v25 = vsub.f32 %v2528_v33, %v2698_v40 }
 0x2bb   : > { %1926 = vpow2.f32 %v1102_v34  ;;  %v1118_v34 = vmul.f32 1.442695, %v3327_v23  ;;  %v3329_v27 = vsub.f32 %v2531_v35, %v2695_v48  ;;  %v3330_v11 = vsub.f32 %v2534_v37, %v2698_v40 }
 0x2bc   : > { %1928 = vpow2.f32 %v1104_v12  ;;  %v1120_v6 = vmul.f32 1.442695, %v3328_v25  ;;  %v3331_v62 = vsub.f32 %v2537_v39, %v2695_v48  ;;  %v3332_v14 = vsub.f32 %v2540_v41, %v2698_v40 }
 0x2bd   : > { %1930 = vpow2.f32 %v1106_v13  ;;  %v1122_v8 = vmul.f32 1.442695, %v3329_v27  ;;  %v1124_v31 = vmul.f32 1.442695, %v3330_v11  ;;  %v3333_v15 = vsub.f32 %v2543_v43, %v2695_v48 }
 0x2be   : > { %1932 = vpow2.f32 %v1108_v26  ;;  %v1126_v13 = vmul.f32 1.442695, %v3331_v62  ;;  %v1128_v26 = vmul.f32 1.442695, %v3332_v14  ;;  %v3334_v17 = vsub.f32 %v2546_v45, %v2698_v40 }
 0x2bf   : > { %1934 = vpow2.f32 %v1110_v38  ;;  %v2869_v2 = vpop.eup %1916  ;;  %v1130_v37 = vmul.f32 1.442695, %v3333_v15  ;;  %v3335_v19 = vsub.f32 %v2549_v47, %v2695_v48  ;;  %v3336_v21 = vsub.f32 %v2552_v49, %v2698_v40 }
 0x2c0   : > { %1936 = vpow2.f32 %v1112_v50  ;;  %v1132_v39 = vmul.f32 1.442695, %v3334_v17  ;;  %v3337_v43 = vsub.f32 %v2555_v51, %v2695_v48  ;;  %v3338_v45 = vsub.f32 %v2558_v53, %v2698_v40 }
 0x2c1   : > { %v1919_v10 = vpop.eup %1918  ;;  %1938 = vpow2.f32 %v1114_v58  ;;  %v1134_v41 = vmul.f32 1.442695, %v3335_v19  ;;  %v3339_v47 = vsub.f32 %v2561_v55, %v2695_v48  ;;  %v3340_v27 = vsub.f32 %v2564_v57, %v2698_v40 }
 0x2c2   : > { %v1921_v29 = vpop.eup %1920  ;;  %1940 = vpow2.f32 %v1116_v52  ;;  %v1136_v52 = vmul.f32 1.442695, %v3336_v21  ;;  %v1138_v23 = vmul.f32 1.442695, %v3337_v43  ;;  %v1140_v25 = vmul.f32 1.442695, %v3338_v45 }
 0x2c3   : > { %v1923_v12 = vpop.eup %1922  ;;  %1942 = vpow2.f32 %v1118_v34  ;;  %v1144_v49 = vmul.f32 1.442695, %v3340_v27  ;;  %v3341_v51 = vsub.f32 %v2567_v59, %v2695_v48 }
 0x2c4   : > { %v1925_v33 = vpop.eup %1924  ;;  %1944 = vpow2.f32 %v1120_v6  ;;  %v1142_v6 = vmul.f32 1.442695, %v3339_v47  ;;  %v1224_v53 = vadd.f32 %v1923_v12, %v1919_v10  ;;  %v3345_v47 = vsub.f32 %v2579_v3, %v2695_v48 }
 0x2c5   : > { %v2886_v35 = vpop.eup %1926  ;;  %1946 = vpow2.f32 %v1122_v8  ;;  %v1146_v11 = vmul.f32 1.442695, %v3341_v51  ;;  %v1261_v14 = vadd.f32 %v1925_v33, %v1921_v29  ;;  %v1739_v55 = vpack.c.bf16 %v1925_v33, %v1921_v29 }
 0x2c6   : > { %v1929_v38 = vpop.eup %1928  ;;  %1948 = vpow2.f32 %v1124_v31  ;;  %v3342_v31 = vsub.f32 %v2570_v61, %v2698_v40  ;;  %v1225_v57 = vadd.f32 %v2886_v35, %v1224_v53  ;;  %v2931_v29 = vrot.slane %v2869_v2, %v2688_v56 }
 0x2c7   : > { %v1931_v50 = vpop.eup %1930  ;;  %1950 = vpow2.f32 %v1126_v13  ;;  %v1262_v59 = vadd.f32 %v1929_v38, %v1261_v14  ;;  %1740 = vmatprep.subr.bf16.mxu1 %v1739_v55  ;;  %v3343_v33 = vsub.f32 %v2573_v63, %v2695_v48  ;;  %v1154_v63 = vmul.f32 1.442695, %v3345_v47 }
 0x2c8   : > { %v1933_v58 = vpop.eup %1932  ;;  %1952 = vpow2.f32 %v1128_v26  ;;  %v1148_v62 = vmul.f32 1.442695, %v3342_v31  ;;  %v1741_v26 = vpack.c.bf16 %v1923_v12, %v1919_v10  ;;  %v1745_v17 = vpack.c.bf16 %v1931_v50, %v2886_v35 }
 0x2c9   : > { %v2903_v34 = vpop.eup %1934  ;;  %1954 = vpow2.f32 %v1130_v37  ;;  %v1743_v37 = vpack.c.bf16 %v1933_v58, %v1929_v38  ;;  %v2927_v10 = vrot.slane %v2869_v2, %v2686_v54  ;;  %v1150_v35 = vmul.f32 1.442695, %v3343_v33 }
 0x2ca   : > { %v1937_v8 = vpop.eup %1936  ;;  %1956 = vpow2.f32 %v1132_v39  ;;  %1742 = vmatpush1.bf16.msra.mxu1 %v1741_v26  ;;  %v1263_v38 = vadd.f32 %v1933_v58, %v1262_v59  ;;  %v3347_v31 = vsub.f32 %v2585_v7, %v2695_v48  ;;  %v3349_v55 = vsub.f32 %v2591_v16, %v2695_v48 }
 0x2cb   : > { %v1939_v13 = vpop.eup %1938  ;;  %1958 = vpow2.f32 %v1134_v41  ;;  %v1226_v41 = vadd.f32 %v1931_v50, %v1225_v57  ;;  %1744 = vmatprep.subr.bf16.mxu1 %v1743_v37  ;;  %v3344_v50 = vsub.f32 %v2576_v1, %v2698_v40  ;;  %v3350_v37 = vsub.f32 %v2594_v20, %v2698_v40 }
 0x2cc   : > { %v1941_v15 = vpop.eup %1940  ;;  %1960 = vpow2.f32 %v1136_v52  ;;  %v1749_v19 = vpack.c.bf16 %v1939_v13, %v2903_v34  ;;  %v1162_v7 = vmul.f32 1.442695, %v3349_v55  ;;  %v3351_v59 = vsub.f32 %v2597_v24, %v2695_v48  ;;  %v3361_v55 = vld [vmem:[#allocation22_spill] sm:$0xff] }
 0x2cd   : > { %v2922_v39 = vpop.eup %1942  ;;  %1962 = vpow2.f32 %v1138_v23  ;;  %v1747_v61 = vpack.c.bf16 %v1941_v15, %v1937_v8  ;;  %v1152_v43 = vmul.f32 1.442695, %v3344_v50  ;;  %v1227_v23 = vadd.f32 %v2903_v34, %v1226_v41 }
 0x2ce   : > { %v1945_v21 = vpop.eup %1944  ;;  %1964 = vpow2.f32 %v1140_v25  ;;  %1746 = vmatpush1.bf16.msra.mxu1 %v1745_v17  ;;  %v3355_v47 = vsub.f32 %v3292_v42, %v2695_v48 }
 0x2cf   : > { %v1947_v12 = vpop.eup %1946  ;;  %1966 = vpow2.f32 %v1142_v6  ;;  %v1264_v6 = vadd.f32 %v1937_v8, %v1263_v38  ;;  %v1228_v51 = vadd.f32 %v1939_v13, %v1227_v23  ;;  %1748 = vmatprep.subr.bf16.mxu1 %v1747_v61  ;;  %v3348_v8 = vsub.f32 %v2588_v9, %v2698_v40 }
 0x2d0   : > { %v1949_v52 = vpop.eup %1948  ;;  %1968 = vpow2.f32 %v1144_v49  ;;  %v1753_v45 = vpack.c.bf16 %v1947_v12, %v2922_v39  ;;  %v3346_v49 = vsub.f32 %v2582_v5, %v2698_v40  ;;  %v1164_v9 = vmul.f32 1.442695, %v3350_v37 }
 0x2d1   : > { %v2941_v25 = vpop.eup %1950  ;;  %1970 = vpow2.f32 %v1146_v11  ;;  %v1751_v58 = vpack.c.bf16 %v1949_v52, %v1945_v21  ;;  %v1158_v11 = vmul.f32 1.442695, %v3347_v31  ;;  %v1265_v53 = vadd.f32 %v1941_v15, %v1264_v6 }
 0x2d2   : > { %v1953_v27 = vpop.eup %1952  ;;  %1972 = vpow2.f32 %v1148_v62  ;;  %v1156_v1 = vmul.f32 1.442695, %v3346_v49  ;;  %v1160_v62 = vmul.f32 1.442695, %v3348_v8  ;;  %v1229_v14 = vadd.f32 %v2922_v39, %v1228_v51  ;;  %1750 = vmatpush1.bf16.msra.mxu1 %v1749_v19  ;;  %v3359_v8 = vld [vmem:[#allocation21_spill] sm:$0xff] }
 0x2d3   : > { %v1955_v34 = vpop.eup %1954  ;;  %1974 = vpow2.f32 %v1150_v35  ;;  %v1266_v26 = vadd.f32 %v1945_v21, %v1265_v53  ;;  %v1166_v61 = vmul.f32 1.442695, %v3351_v59  ;;  %1752 = vmatprep.subr.bf16.mxu1 %v1751_v58  ;;  %v3352_v21 = vsub.f32 %v2600_v28, %v2698_v40 }
 0x2d4   : > { %v1957_v3 = vpop.eup %1956  ;;  %1976 = vpow2.f32 %v1152_v43  ;;  %v1757_v5 = vpack.c.bf16 %v1955_v34, %v2941_v25  ;;  %v1230_v17 = vadd.f32 %v1947_v12, %v1229_v14  ;;  %v3353_v19 = vsub.f32 %v2603_v32, %v2695_v48 }
 0x2d5   : > { %v2957_v13 = vpop.eup %1958  ;;  %1978 = vpow2.f32 %v1154_v63  ;;  %v1755_v15 = vpack.c.bf16 %v1957_v3, %v1953_v27  ;;  %v1267_v41 = vadd.f32 %v1949_v52, %v1266_v26  ;;  %v1168_v33 = vmul.f32 1.442695, %v3352_v21 }
 0x2d6   : > { %v1961_v57 = vpop.eup %1960  ;;  %1980 = vpow2.f32 %v1156_v1  ;;  %v1231_v35 = vadd.f32 %v2941_v25, %v1230_v17  ;;  %v1170_v24 = vmul.f32 1.442695, %v3353_v19  ;;  %v3354_v43 = vsub.f32 %v2606_v36, %v2698_v40  ;;  %1754 = vmatpush1.bf16.msra.mxu1 %v1753_v45 }
 0x2d7   : > { %v1963_v39 = vpop.eup %1962  ;;  %1982 = vpow2.f32 %v1158_v11  ;;  %v1268_v38 = vadd.f32 %v1953_v27, %v1267_v41  ;;  %v1174_v63 = vmul.f32 1.442695, %v3355_v47  ;;  %1756 = vmatprep.subr.bf16.mxu1 %v1755_v15  ;;  %v3356_v58 = vsub.f32 %v3293_v60, %v2698_v40 }
 0x2d8   : > { %v1965_v16 = vpop.eup %1964  ;;  %1984 = vpow2.f32 %v1160_v62  ;;  %v1761_v20 = vpack.c.bf16 %v1963_v39, %v2957_v13  ;;  %v1172_v28 = vmul.f32 1.442695, %v3354_v43  ;;  %v1232_v23 = vadd.f32 %v1955_v34, %v1231_v35  ;;  %v3367_v35 = vld [vmem:[#allocation25_spill] sm:$0xff] }
 0x2d9   : > { %v2973_v12 = vpop.eup %1966  ;;  %1986 = vpow2.f32 %v1162_v7  ;;  %v1759_v52 = vpack.c.bf16 %v1965_v16, %v1961_v57  ;;  %v1269_v6 = vadd.f32 %v1957_v3, %v1268_v38  ;;  %v1176_v27 = vmul.f32 1.442695, %v3356_v58 }
 0x2da   : > { %v1969_v50 = vpop.eup %1968  ;;  %1988 = vpow2.f32 %v1164_v9  ;;  %v1233_v49 = vadd.f32 %v2957_v13, %v1232_v23  ;;  %v3357_v45 = vsub.f32 %v3294_v18, %v2695_v48  ;;  %v3358_v11 = vsub.f32 %v3295_v44, %v2698_v40  ;;  %1758 = vmatpush1.bf16.msra.mxu1 %v1757_v5  ;;  %v3363_v5 = vld [vmem:[#allocation23_spill] sm:$0xff] }
 0x2db   : > { %v1971_v25 = vpop.eup %1970  ;;  %1990 = vpow2.f32 %v1166_v61  ;;  %v1270_v51 = vadd.f32 %v1961_v57, %v1269_v6  ;;  %v3360_v62 = vsub.f32 %v3359_v8, %v2695_v48  ;;  %1760 = vmatprep.subr.bf16.mxu1 %v1759_v52  ;;  %v3362_v7 = vsub.f32 %v3361_v55, %v2698_v40  ;;  %v3365_v61 = vld [vmem:[#allocation24_spill] sm:$0xff]  ;;  %v3369_v52 = vld [vmem:[#allocation26_spill] sm:$0xff] }
 0x2dc   : > { %v1973_v32 = vpop.eup %1972  ;;  %1992 = vpow2.f32 %v1168_v33  ;;  %v1765_v36 = vpack.c.bf16 %v1971_v25, %v2973_v12  ;;  %v1178_v42 = vmul.f32 1.442695, %v3357_v45  ;;  %v1180_v60 = vmul.f32 1.442695, %v3358_v11 }
 0x2dd   : > { %v2989_v1 = vpop.eup %1974  ;;  %1994 = vpow2.f32 %v1170_v24  ;;  %v1763_v34 = vpack.c.bf16 %v1973_v32, %v1969_v50  ;;  %v1234_v53 = vadd.f32 %v1963_v39, %v1233_v49  ;;  %v1182_v14 = vmul.f32 1.442695, %v3360_v62 }
 0x2de   : > { %v1977_v31 = vpop.eup %1976  ;;  %1996 = vpow2.f32 %v1172_v28  ;;  %v1271_v13 = vadd.f32 %v1965_v16, %v1270_v51  ;;  %v1184_v26 = vmul.f32 1.442695, %v3362_v7  ;;  %v3364_v37 = vsub.f32 %v3363_v5, %v2695_v48  ;;  %1762 = vmatpush1.bf16.msra.mxu1 %v1761_v20  ;;  %v3371_v20 = vld [vmem:[#allocation27_spill] sm:$0xff]  ;;  %v3375_v51 = vld [vmem:[#allocation29_spill] sm:$0xff]  ;;  %v3381_v5 = vld [vmem:[#allocation32_spill] sm:$0xff] }
 0x2df   : > { %v1979_v3 = vpop.eup %1978  ;;  %1998 = vpow2.f32 %v1174_v63  ;;  %v1235_v15 = vadd.f32 %v2973_v12, %v1234_v53  ;;  %v3366_v41 = vsub.f32 %v3365_v61, %v2698_v40  ;;  %v3368_v12 = vsub.f32 %v3367_v35, %v2695_v48  ;;  %1764 = vmatprep.subr.bf16.mxu1 %v1763_v34 }
 0x2e0   : > { %v1981_v18 = vpop.eup %1980  ;;  %2000 = vpow2.f32 %v1176_v27  ;;  %v1769_v44 = vpack.c.bf16 %v1979_v3, %v2989_v1  ;;  %v1186_v9 = vmul.f32 1.442695, %v3364_v37  ;;  %v1272_v17 = vadd.f32 %v1969_v50, %v1271_v13  ;;  %v3373_v27 = vld [vmem:[#allocation28_spill] sm:$0xff] }
 0x2e1   : > { %v3005_v57 = vpop.eup %1982  ;;  %2002 = vpow2.f32 %v1178_v42  ;;  %v1767_v39 = vpack.c.bf16 %v1981_v18, %v1977_v31  ;;  %v1188_v16 = vmul.f32 1.442695, %v3366_v41  ;;  %v1236_v21 = vadd.f32 %v1971_v25, %v1235_v15 }
 0x2e2   : > { %v1985_v59 = vpop.eup %1984  ;;  %2004 = vpow2.f32 %v1180_v60  ;;  %v1190_v19 = vmul.f32 1.442695, %v3368_v12  ;;  %v1273_v24 = vadd.f32 %v1973_v32, %v1272_v17  ;;  %v3370_v50 = vsub.f32 %v3369_v52, %v2698_v40  ;;  %1766 = vmatpush1.bf16.msra.mxu1 %v1765_v36  ;;  %v3379_v36 = vld [vmem:[#allocation31_spill] sm:$0xff] }
 0x2e3   : > { %v1987_v33 = vpop.eup %1986  ;;  %2006 = vpow2.f32 %v1182_v14  ;;  %v1237_v28 = vadd.f32 %v2989_v1, %v1236_v21  ;;  %v3372_v47 = vsub.f32 %v3371_v20, %v2695_v48  ;;  %v3374_v49 = vsub.f32 %v3373_v27, %v2698_v40  ;;  %1768 = vmatprep.subr.bf16.mxu1 %v1767_v39 }
 0x2e4   : > { %v1989_v38 = vpop.eup %1988  ;;  %2008 = vpow2.f32 %v1184_v26  ;;  %v1192_v43 = vmul.f32 1.442695, %v3370_v50  ;;  %v1773_v23 = vpack.c.bf16 %v1987_v33, %v3005_v57  ;;  %v1274_v6 = vadd.f32 %v1977_v31, %v1273_v24  ;;  %v3377_v31 = vld [vmem:[#allocation30_spill] sm:$0xff] }
 0x2e5   : > { %v3021_v25 = vpop.eup %1990  ;;  %2010 = vpow2.f32 %v1186_v9  ;;  %v1194_v63 = vmul.f32 1.442695, %v3372_v47  ;;  %v1771_v32 = vpack.c.bf16 %v1989_v38, %v1985_v59  ;;  %v1196_v45 = vmul.f32 1.442695, %v3374_v49 }
 0x2e6   : > { %v1993_v58 = vpop.eup %1992  ;;  %2012 = vpow2.f32 %v1188_v16  ;;  %v1238_v42 = vadd.f32 %v1979_v3, %v1237_v28  ;;  %v3376_v34 = vsub.f32 %v3375_v51, %v2695_v48  ;;  %v1275_v60 = vadd.f32 %v1981_v18, %v1274_v6  ;;  %1770 = vmatpush1.bf16.msra.mxu1 %v1769_v44 }
 0x2e7   : > { %v1995_v1 = vpop.eup %1994  ;;  %2014 = vpow2.f32 %v1190_v19  ;;  %v3378_v8 = vsub.f32 %v3377_v31, %v2698_v40  ;;  %v3380_v55 = vsub.f32 %v3379_v36, %v2695_v48  ;;  %v3382_v37 = vsub.f32 %v3381_v5, %v2698_v40  ;;  %1772 = vmatprep.subr.bf16.mxu1 %v1771_v32 }
 0x2e8   : > { %v1198_v11 = vmul.f32 1.442695, %v3376_v34  ;;  %v1997_v53 = vpop.eup %1996  ;;  %2016 = vpow2.f32 %v1192_v43  ;;  %v1239_v14 = vadd.f32 %v3005_v57, %v1238_v42  ;;  %v1777_v13 = vpack.c.bf16 %v1995_v1, %v3021_v25  ;;  %v3392_v34 = vld [vmem:[#allocation40_spill] sm:$0xff] }
 0x2e9   : > { %v1200_v62 = vmul.f32 1.442695, %v3378_v8  ;;  %v3037_v3 = vpop.eup %1998  ;;  %2018 = vpow2.f32 %v1194_v63  ;;  %v1202_v7 = vmul.f32 1.442695, %v3380_v55  ;;  %v1276_v26 = vadd.f32 %v1985_v59, %v1275_v60  ;;  %v3384_v59 = vld [vmem:[#allocation34_spill] sm:$0xff] }
 0x2ea   : > { %v1775_v18 = vpack.c.bf16 %v1997_v53, %v1993_v58  ;;  %v2001_v15 = vpop.eup %2000  ;;  %2020 = vpow2.f32 %v1196_v45  ;;  %v1204_v9 = vmul.f32 1.442695, %v3382_v37  ;;  %v1240_v17 = vadd.f32 %v1987_v33, %v1239_v14  ;;  %1774 = vmatpush1.bf16.msra.mxu1 %v1773_v23 }
 0x2eb   : > { %v2003_v57 = vpop.eup %2002  ;;  %2022 = vpow2.f32 %v1198_v11  ;;  %v3383_v39 = vsub.f32 %v3308_v0, %v2695_v48  ;;  %v1277_v41 = vadd.f32 %v1989_v38, %v1276_v26  ;;  %v3385_v21 = vsub.f32 %v3384_v59, %v2698_v40 }
 0x2ec   : > { %v2005_v16 = vpop.eup %2004  ;;  %2024 = vpow2.f32 %v1200_v62  ;;  %v1241_v12 = vadd.f32 %v3021_v25, %v1240_v17  ;;  %v1781_v19 = vpack.c.bf16 %v2003_v57, %v3037_v3  ;;  %v3386_v44 = vsub.f32 %v3310_v46, %v2695_v48  ;;  %v3388_v25 = vld [vmem:[#allocation37_spill] sm:$0xff]  ;;  %1776 = vmatprep.subr.bf16.mxu1 %v1775_v18 }
 0x2ed   : > { %v1206_v61 = vmul.f32 1.442695, %v3383_v39  ;;  %v1208_v35 = vmul.f32 1.442695, %v3385_v21  ;;  %v2007_v33 = vpop.eup %2006  ;;  %2026 = vpow2.f32 %v1202_v7  ;;  %v1278_v0 = vadd.f32 %v1993_v58, %v1277_v41 }
 0x2ee   : > { %v1210_v24 = vmul.f32 1.442695, %v3386_v44  ;;  %v1779_v52 = vpack.c.bf16 %v2005_v16, %v2001_v15  ;;  %v2009_v38 = vpop.eup %2008  ;;  %2028 = vpow2.f32 %v1204_v9  ;;  %v3387_v50 = vsub.f32 %v3311_v4, %v2698_v40  ;;  %1778 = vmatpush1.bf16.msra.mxu1 %v1777_v13 }
 0x2ef   : > { %v1242_v28 = vadd.f32 %v1995_v1, %v1241_v12  ;;  %v2011_v20 = vpop.eup %2010  ;;  %2030 = vpow2.f32 %v1206_v61  ;;  %v3389_v47 = vsub.f32 %v3388_v25, %v2695_v48  ;;  %v1279_v6 = vadd.f32 %v1997_v53, %v1278_v0 }
 0x2f0   : > { %v1212_v43 = vmul.f32 1.442695, %v3387_v50  ;;  %v2013_v46 = vpop.eup %2012  ;;  %2032 = vpow2.f32 %v1208_v35  ;;  %v3390_v32 = vsub.f32 %v3313_v30, %v2698_v40  ;;  %v1785_v4 = vpack.c.bf16 %v2011_v20, %v2007_v33  ;;  %1780 = vmatprep.subr.bf16.mxu1 %v1779_v52 }
 0x2f1   : > { %v1214_v63 = vmul.f32 1.442695, %v3389_v47  ;;  %v1243_v27 = vadd.f32 %v3037_v3, %v1242_v28  ;;  %v2015_v49 = vpop.eup %2014  ;;  %2034 = vpow2.f32 %v1210_v24  ;;  %v3391_v23 = vsub.f32 %v3314_v22, %v2695_v48 }
 0x2f2   : > { %v1216_v58 = vmul.f32 1.442695, %v3390_v32  ;;  %v1280_v42 = vadd.f32 %v2001_v15, %v1279_v6  ;;  %v1783_v1 = vpack.c.bf16 %v2013_v46, %v2009_v38  ;;  %v2017_v51 = vpop.eup %2016  ;;  %2036 = vpow2.f32 %v1212_v43  ;;  %1782 = vmatpush1.bf16.msra.mxu1 %v1781_v19 }
 0x2f3   : > { %v1218_v45 = vmul.f32 1.442695, %v3391_v23  ;;  %v3393_v11 = vsub.f32 %v3392_v34, %v2698_v40  ;;  %v1244_v53 = vadd.f32 %v2003_v57, %v1243_v27  ;;  %v2019_v30 = vpop.eup %2018  ;;  %2038 = vpow2.f32 %v1214_v63 }
 0x2f4   : > { %v1281_v31 = vadd.f32 %v2005_v16, %v1280_v42  ;;  %v2021_v8 = vpop.eup %2020  ;;  %2040 = vpow2.f32 %v1216_v58  ;;  %v1789_v14 = vpack.c.bf16 %v2019_v30, %v2015_v49  ;;  %1784 = vmatprep.subr.bf16.mxu1 %v1783_v1  ;;  %v552_v58 = vld [vmem:[%s2374_s2] sm:$0xff]  ;;  %v554_v42 = vld [vmem:[%s2374_s2 + $0x10] sm:$0xff] }
 0x2f5   : > { %v1220_v60 = vmul.f32 1.442695, %v3393_v11  ;;  %v1245_v62 = vadd.f32 %v2007_v33, %v1244_v53  ;;  %v2023_v48 = vpop.eup %2022  ;;  %2042 = vpow2.f32 %v1218_v45  ;;  %v1787_v3 = vpack.c.bf16 %v2021_v8, %v2017_v51  ;;  %v556_v53 = vld [vmem:[%s2374_s2 + $0x20] sm:$0xff] }
 0x2f6   : > { %v1282_v22 = vadd.f32 %v2009_v38, %v1281_v31  ;;  %v2025_v36 = vpop.eup %2024  ;;  %1786 = vmatpush1.bf16.msra.mxu1 %v1785_v4  ;;  %v555_v4 = vld [vmem:[%s2374_s2 + $0x18] sm:$0xff] }
 0x2f7   : > { %2044 = vpow2.f32 %v1220_v60  ;;  %v1246_v55 = vadd.f32 %v2011_v20, %v1245_v62  ;;  %v2027_v40 = vpop.eup %2026  ;;  %1788 = vmatprep.subr.bf16.mxu1 %v1787_v3  ;;  %v559_v31 = vld [vmem:[%s2374_s2 + $0x38] sm:$0xff] }
 0x2f8   : > { %v1283_v7 = vadd.f32 %v2013_v46, %v1282_v22  ;;  %v2029_v13 = vpop.eup %2028  ;;  %v1793_v18 = vpack.c.bf16 %v2027_v40, %v2023_v48  ;;  %v1222_v62 = vld [vmem:[#allocation4] sm:$0x3] }
 0x2f9   : > { %v1247_v26 = vadd.f32 %v2015_v49, %v1246_v55  ;;  %v2031_v15 = vpop.eup %2030  ;;  %v1791_v37 = vpack.c.bf16 %v2029_v13, %v2025_v36  ;;  %v1223_v3 = vmul.f32 %v2869_v2, %v1222_v62 }
 0x2fa   : > { %v1284_v5 = vadd.f32 %v2017_v51, %v1283_v7  ;;  %v2033_v9 = vpop.eup %2032  ;;  %1790 = vmatpush1.bf16.msra.mxu1 %v1789_v14  ;;  %v557_v51 = vld [vmem:[%s2374_s2 + $0x28] sm:$0xff]  ;;  %v558_v14 = vld [vmem:[%s2374_s2 + $0x30] sm:$0xff]  ;;  %v1411_v7 = vld [vmem:[#allocation5] sm:$0xff]  ;;  %s1489_s2 = sld [smem:[#allocation6]] (!%p1724_p8) }
 0x2fb   : > { %v1248_v17 = vadd.f32 %v2019_v30, %v1247_v26  ;;  %v2035_v57 = vpop.eup %2034  ;;  %1792 = vmatprep.subr.bf16.mxu1 %v1791_v37  ;;  %v1430_v26 = vmul.f32 %v2927_v10, %v1411_v7 }
 0x2fc   : > { %v1285_v39 = vadd.f32 %v2021_v8, %v1284_v5  ;;  %v2037_v61 = vpop.eup %2036  ;;  %v1797_v16 = vpack.c.bf16 %v2035_v57, %v2031_v15  ;;  %v1413_v5 = vld [vmem:[#allocation5 + $0x10] sm:$0xff] }
 0x2fd   : > { %v1249_v41 = vadd.f32 %v2023_v48, %v1248_v17  ;;  %v2039_v59 = vpop.eup %2038  ;;  %v1795_v35 = vpack.c.bf16 %v2037_v61, %v2033_v9  ;;  %v3394_v48 = vld [vmem:[#allocation41_spill] sm:$0xff]  ;;  %v1414_v17 = vld [vmem:[#allocation5 + $0x18] sm:$0xff]  ;;  %v1432_v2 = vmul.f32 %v2927_v10, %v1413_v5 }
 0x2fe   : > { %v1286_v21 = vadd.f32 %v2025_v36, %v1285_v39  ;;  %v2041_v12 = vpop.eup %2040  ;;  %1794 = vmatpush1.bf16.msra.mxu1 %v1793_v18 }
 0x2ff   : > { %v1250_v19 = vadd.f32 %v2027_v40, %v1249_v41  ;;  %v2043_v33 = vpop.eup %2042  ;;  %1796 = vmatprep.subr.bf16.mxu1 %v1795_v35  ;;  %v1415_v41 = vld [vmem:[#allocation5 + $0x20] sm:$0xff]  ;;  %v1504_v40 = vld [vmem:[%s2372_s0 + $0x28] sm:$0xff] (!%p1724_p8) }
 0x300   : > { %v1287_v44 = vadd.f32 %v2029_v13, %v1286_v21  ;;  %v1801_v52 = vpack.c.bf16 %v2043_v33, %v2039_v59  ;;  %v1412_v13 = vld [vmem:[#allocation5 + $0x8] sm:$0xff] }
 0x301   : > { %v2045_v24 = vpop.eup %2044  ;;  %v1251_v0 = vadd.f32 %v2031_v15, %v1250_v19  ;;  %v1431_v15 = vmul.f32 %v2931_v29, %v1412_v13  ;;  %v1416_v21 = vld [vmem:[#allocation5 + $0x28] sm:$0xff]  ;;  %v1506_v13 = vld [vmem:[%s2372_s0 + $0x38] sm:$0xff] (!%p1724_p8) }
 0x302   : > { %v1288_v38 = vadd.f32 %v2033_v9, %v1287_v44  ;;  %v1799_v50 = vpack.c.bf16 %v2045_v24, %v2041_v12  ;;  %1798 = vmatpush1.bf16.msra.mxu1 %v1797_v16  ;;  %v1417_v44 = vld [vmem:[#allocation5 + $0x30] sm:$0xff] }
 0x303   : > { %v1252_v43 = vadd.f32 %v2035_v57, %v1251_v0 }
 0x304   : > { %v1289_v28 = vadd.f32 %v2037_v61, %v1288_v38  ;;  %1800 = vmatprep.subr.bf16.mxu1 %v1799_v50  ;;  %v1433_v61 = vmul.f32 %v2931_v29, %v1414_v17  ;;  %v1436_v50 = vmul.f32 %v2927_v10, %v1417_v44 }
 0x305   : > { %v1253_v20 = vadd.f32 %v2039_v59, %v1252_v43 }
 0x306   : > { %v1290_v25 = vadd.f32 %v2041_v12, %v1289_v28  ;;  %1802 = vmatpush1.bf16.msra.mxu1 %v1801_v52  ;;  %v1434_v12 = vmul.f32 %v2927_v10, %v1415_v41  ;;  %v1418_v52 = vld [vmem:[#allocation5 + $0x38] sm:$0xff] }
 0x307   : > { %v1254_v47 = vadd.f32 %v2043_v33, %v1253_v20  ;;  %v1435_v33 = vmul.f32 %v2931_v29, %v1416_v21  ;;  %v1437_v28 = vmul.f32 %v2931_v29, %v1418_v52 }
 0x308   : > { %v1291_v63 = vadd.f32 %v2045_v24, %v1290_v25 }
 0x309   : > { %v1255_v6 = vrot.slane %v1254_v47, 4  ;;  %1387 = vmatmul.mubr.f32.vlgmr.msra.gmra.mrb[0].mxu1 %v552_v58 }
 0x30a   : > { %v1292_v46 = vrot.slane %v1291_v63, 4  ;;  %1392 = vmatprep.mubr.f32.mxu1 %v555_v4 }
 0x30b   : > { %v1256_v32 = vadd.f32 %v1255_v6, %v1254_v47 }
 0x30c   : > { %v1293_v27 = vadd.f32 %v1292_v46, %v1291_v63 }
 0x30d   : > { %v1257_v49 = vrot.slane %v1256_v32, 2  ;;  %1393 = vmatmul.mubr.f32.gmra.mrb[2].mxu1 %v554_v42 }
 0x30e   : > { %v1294_v23 = vrot.slane %v1293_v27, 2  ;;  %1398 = vmatprep.mubr.f32.mxu1 %v557_v51  ;;  %v1500_v51 = vld [vmem:[%s2372_s0 + $0x8] sm:$0xff] (!%p1724_p8) }
 0x30f   : > { %v1258_v45 = vadd.f32 %v1257_v49, %v1256_v32 }
 0x310   : > { %v1295_v1 = vadd.f32 %v1294_v23, %v1293_v27 }
 0x311   : > { %v1259_v34 = vrot.slane %v1258_v45, 1  ;;  %1399 = vmatmul.mubr.f32.gmra.mrb[4].mxu1 %v556_v53 }
 0x312   : > { %v1296_v11 = vrot.slane %v1295_v1, 1  ;;  %1404 = vmatprep.mubr.f32.mxu1 %v559_v31 }
 0x313   : > { %v1260_v60 = vadd.f32 %v1259_v34, %v1258_v45 }
 0x314   : > { %v1297_v30 = vadd.f32 %v1296_v11, %v1295_v1  ;;  %v1499_v1 = vld [vmem:[%s2372_s0] sm:$0xff] (!%p1724_p8) }
 0x315   : > { %1405 = vmatmul.mubr.f32.gmra.mrb[6].mxu1 %v558_v14  ;;  %v1505_v14 = vld [vmem:[%s2372_s0 + $0x30] sm:$0xff] (!%p1724_p8) }
 0x316   : > { %v1300_v8 = vcombine.low %v1260_v60, %v1297_v30  ;;  %v1501_v30 = vld [vmem:[%s2372_s0 + $0x10] sm:$0xff] (!%p1724_p8) }
 0x318   : > { %v1307_v22 = vrot.slane %v1300_v8, %v3394_v48  ;;  %v1503_v8 = vld [vmem:[%s2372_s0 + $0x20] sm:$0xff] (!%p1724_p8) }
 0x31a   : > { %v1314_v36 = vrot.slane %v1307_v22, %v3394_v48 }
 0x31c   : > { %v1316_v55 = vadd.f32 %v1314_v36, %v1223_v3  ;;  %v1502_v36 = vld [vmem:[%s2372_s0 + $0x18] sm:$0xff] (!%p1724_p8) }
 0x31e   : > { %1321 = vst.msk [vmem:[#allocation4] sm:$0x3] %vm2690_vm4, %v1316_v55 }
 0x325   : > { %v1467_v63 = vld [vmem:[#allocation4] sm:$0x3] (!%p1724_p8) }
 0x326   : > { %v1472_v6 = vrot.slane (!%p1724_p8), %v1467_v63, %v2686_v54  ;;  %v1476_v46 = vrot.slane (!%p1724_p8), %v1467_v63, %v2688_v56  ;;  %v1490_v54 = vstv (!%p1724_p8), %s1489_s2 }
 0x328   : > { %2046 = vrcp.f32 (!%p1724_p8), %v1472_v6 }
 0x329   : > { %2048 = vrcp.f32 (!%p1724_p8), %v1476_v46 }
 0x332   : > { %v2047_v45 = vpop.eup (!%p1724_p8), %2046 }
 0x333   : > { %v2049_v42 = vpop.eup (!%p1724_p8), %2048 }
 0x3dc   : > { %v1388_v18 = vpop.f32.mrb[0].mxu1 }
 0x3dd   : > { %v1438_v37 = vadd.f32 %v1430_v26, %v1388_v18  ;;  %v1390_v9 = vpop.f32.mrb[1].mxu1 }
 0x3de   : > { %v1439_v57 = vadd.f32 %v1431_v15, %v1390_v9 }
 0x3df   : > { %1446 = vst [vmem:[#allocation5] sm:$0xff] %v1438_v37 }
 0x3e0   : > { %1447 = vst [vmem:[#allocation5 + $0x8] sm:$0xff] %v1439_v57  ;;  %v1394_v39 = vpop.f32.mrb[2].mxu1 }
 0x3e1   : > { %v1440_v16 = vadd.f32 %v1432_v2, %v1394_v39  ;;  %v1396_v59 = vpop.f32.mrb[3].mxu1 }
 0x3e2   : > { %v1441_v35 = vadd.f32 %v1433_v61, %v1396_v59 }
 0x3e3   : > { %1448 = vst [vmem:[#allocation5 + $0x10] sm:$0xff] %v1440_v16 }
 0x3e4   : > { %1449 = vst [vmem:[#allocation5 + $0x18] sm:$0xff] %v1441_v35  ;;  %v1400_v19 = vpop.f32.mrb[4].mxu1 }
 0x3e5   : > { %v1442_v24 = vadd.f32 %v1434_v12, %v1400_v19  ;;  %v1402_v0 = vpop.f32.mrb[5].mxu1 }
 0x3e6   : > { %v1443_v38 = vadd.f32 %v1435_v33, %v1402_v0  ;;  %1458 = sbr.rel (%p1724_p8) target bundleno = 1019 (0x3fb), region = 98  ;;  %v1459_v10 = vld [vmem:[#allocation5] sm:$0xff] (!%p1724_p8) }
 0x3e7   : > { %1450 = vst [vmem:[#allocation5 + $0x20] sm:$0xff] %v1442_v24  ;;  %v1460_v29 = vld [vmem:[#allocation5 + $0x8] sm:$0xff] (!%p1724_p8)  ;;  %v1480_v56 = vmul.f32 (!%p1724_p8), %v2047_v45, %v1459_v10 }
 0x3e8   : > { %1451 = vst [vmem:[#allocation5 + $0x28] sm:$0xff] %v1443_v38  ;;  %v1406_v43 = vpop.f32.mrb[6].mxu1  ;;  %v1482_v53 = vmul.f32 (!%p1724_p8), %v2049_v42, %v1460_v29 }
 0x3e9   : > { %v1444_v20 = vadd.f32 %v1436_v50, %v1406_v43  ;;  %v1408_v25 = vpop.f32.mrb[7].mxu1  ;;  %v1491_v22 = vmul.f32 (!%p1724_p8), %v1490_v54, %v1480_v56 }
 0x3ea   : > { %v1445_v47 = vadd.f32 %v1437_v28, %v1408_v25  ;;  %v1461_v32 = vld [vmem:[#allocation5 + $0x10] sm:$0xff] (!%p1724_p8)  ;;  %v1492_v26 = vmul.f32 (!%p1724_p8), %v1490_v54, %v1482_v53 }
 0x3eb   : > { %1452 = vst [vmem:[#allocation5 + $0x30] sm:$0xff] %v1444_v20  ;;  %v1462_v4 = vld [vmem:[#allocation5 + $0x18] sm:$0xff] (!%p1724_p8)  ;;  %v1483_v34 = vmul.f32 (!%p1724_p8), %v2047_v45, %v1461_v32  ;;  %v1507_v37 = vadd.f32 (!%p1724_p8), %v1499_v1, %v1491_v22 }
 0x3ec   : > { %1453 = vst [vmem:[#allocation5 + $0x38] sm:$0xff] %v1445_v47  ;;  %v1484_v31 = vmul.f32 (!%p1724_p8), %v2049_v42, %v1462_v4  ;;  %v1508_v2 = vadd.f32 (!%p1724_p8), %v1500_v51, %v1492_v26 }
 0x3ed   : > { %v1493_v3 = vmul.f32 %v1490_v54, %v1483_v34  ;;  %1515 = vst [vmem:[%s2376_s24] sm:$0xff] %v1507_v37 }
 0x3ee   : > { %v1463_v58 = vld [vmem:[#allocation5 + $0x20] sm:$0xff]  ;;  %v1494_v18 = vmul.f32 %v1490_v54, %v1484_v31  ;;  %1516 = vst [vmem:[%s2376_s24 + $0x8] sm:$0xff] %v1508_v2 }
 0x3ef   : > { %v1464_v49 = vld [vmem:[#allocation5 + $0x28] sm:$0xff]  ;;  %v1485_v11 = vmul.f32 %v2047_v45, %v1463_v58  ;;  %v1509_v9 = vadd.f32 %v1501_v30, %v1493_v3 }
 0x3f0   : > { %v1486_v62 = vmul.f32 %v2049_v42, %v1464_v49  ;;  %v1510_v39 = vadd.f32 %v1502_v36, %v1494_v18 }
 0x3f1   : > { %v1495_v55 = vmul.f32 %v1490_v54, %v1485_v11  ;;  %1517 = vst [vmem:[%s2376_s24 + $0x10] sm:$0xff] %v1509_v9 }
 0x3f2   : > { %v1465_v27 = vld [vmem:[#allocation5 + $0x30] sm:$0xff]  ;;  %v1496_v15 = vmul.f32 %v1490_v54, %v1486_v62  ;;  %1518 = vst [vmem:[%s2376_s24 + $0x18] sm:$0xff] %v1510_v39 }
 0x3f3   : > { %v1466_v23 = vld [vmem:[#allocation5 + $0x38] sm:$0xff]  ;;  %v1487_v60 = vmul.f32 %v2047_v45, %v1465_v27  ;;  %v1511_v17 = vadd.f32 %v1503_v8, %v1495_v55 }
 0x3f4   : > { %v1488_v48 = vmul.f32 %v2049_v42, %v1466_v23  ;;  %v1512_v61 = vadd.f32 %v1504_v40, %v1496_v15 }
 0x3f5   : > { %v1497_v7 = vmul.f32 %v1490_v54, %v1487_v60  ;;  %1519 = vst [vmem:[%s2376_s24 + $0x20] sm:$0xff] %v1511_v17 }
 0x3f6   : > { %v1498_v5 = vmul.f32 %v1490_v54, %v1488_v48  ;;  %1520 = vst [vmem:[%s2376_s24 + $0x28] sm:$0xff] %v1512_v61 }
 0x3f7   : > { %v1513_v57 = vadd.f32 %v1505_v14, %v1497_v7 }
 0x3f8   : > { %v1514_v41 = vadd.f32 %v1506_v13, %v1498_v5 }
 0x3f9   : > { %1521 = vst [vmem:[%s2376_s24 + $0x30] sm:$0xff] %v1513_v57 }
 0x3fa   : > { %1522 = vst [vmem:[%s2376_s24 + $0x38] sm:$0xff] %v1514_v41 }
 0x3fb PF: > { %s1726_s0 = sshll.u32 %s2156_s29, 1  ;;  %s1727_s28 = sshll.u32 %s2160_s30, 5 }
 0x3fc   : > { %s1539_s21 = sshll.u32 %s2376_s24, 4  ;;  %s1536_s18 = sadd.s32 %s1727_s28, %s1726_s0  ;;  %s3114_s21 = int_to_ptr.vmem [resolvable:$true] %s1539_s21 }
 0x3fd   : > { %s1728_s16 = sshll.u32 %s1536_s18, 7  ;;  %s3396_s15 = sld [smem:[#allocation45_spill]] }
 0x3fe   : > { %s3123_s22 = scalar_lea.sflag [#allocation10], %s345_s19  ;;  %s2050_s23 = scalar_lea.vmem %s3114_s21, 1024 }
 0x3ff   : > { %p2051_p9 = scmp.ne.s32.totalorder %s3114_s21, %s2050_s23  ;;  %s2183_s29 = smov [#allocation9]  }
 0x400   : > { %s2054_s30 = sshll.u32 %s2183_s29, 4  ;;  %s2055_s30 = int_to_ptr.vmem [resolvable:$false] %s2054_s30 }
 0x401   : > { %p2052_p10 = pnand %p2051_p9, %p2324_p11  ;;  %s2056_s24 = scalar_lea.vmem %s2055_s30, 2048 }
 0x402   : > { %p2057_p0 = scmp.lt.s32.totalorder %s3114_s21, %s2055_s30  ;;  %p2058_p2 = scmp.lt.s32.totalorder %s2056_s24, %s2050_s23 }
 0x403   : > { %s3119_s13 = scalar_lea.hbm %s3396_s15, %s1728_s16  ;;  %p2053_p13 = pneg %p2052_p10 }
 0x404   : > { %p2059_p1 = por %p2058_p2, %p2057_p0 }
 0x406   : > { %p2060_p3 = pnand %p2059_p1, %p2053_p13 }
 0x408   : > { %2063 = shalt.err (!%p2060_p3)
}
 0x409   : > { %s2064_s19 = scalar_lea.hbm %s3119_s13, 1024  ;;  %s2068_s2 = scalar_lea.hbm %s3396_s15, 8192 }
 0x40a   : > { %p2065_p4 = scmp.ne.s32.totalorder %s3119_s13, %s2064_s19  ;;  %p2069_p7 = scmp.lt.u32.totalorder %s3119_s13, %s3396_s15 }
 0x40b   : > { %p2070_p8 = scmp.lt.u32.totalorder %s2068_s2, %s2064_s19  ;;  %p2072_p10 = scmp.lt.u32.totalorder %s2064_s19, %s3119_s13 }
 0x40c   : > { %p2066_p5 = pnand %p2065_p4, %p2324_p11 }
 0x40d   : > { %p2071_p9 = por %p2070_p8, %p2069_p7 }
 0x40e   : > { %p2067_p6 = pneg %p2066_p5 }
 0x40f   : > { %p2073_p13 = por %p2072_p10, %p2071_p9 }
 0x411   : > { %p2074_p0 = pnand %p2073_p13, %p2067_p6 }
 0x413   : > { %2077 = shalt.err (!%p2074_p0)
}
 0x414   : > { %s2184_s18 = smov 256   ;;  %s2185_s16 = smov 1024  }
 0x415   : > { %s2186_s12 = smov 16  }
 0x416   : > { %1803 = dma.vmem_to_hbm [thread:$0]  (%p2324_p11), %s3114_s21, 1024, %s3119_s13, %s3123_s22, %s2184_s18, %s2185_s16, %s2186_s12  }
 0x417 PF: > { %s3397_s6 = sld [smem:[#allocation12_spill]]  ;;  %p1809_p2 = scmp.ge.s32.totalorder %s2176_s9, 2 }
 0x419   : > { %p1806_p1 = pnand %p1809_p2, %p2328_p12 }
 0x41d   : > { %s1554_s29 = sand.u32 1, %s3397_s6  }
 0x41e   : > { %s1555_s30 = scalar_lea.sflag [#allocation10], %s1554_s29 }
 0x41f   : > { %2127 = dma.done.wait (!%p1806_p1), %s1555_s30, 1024  }
 0x420   : > { %2129 = vsyncadd (!%p1806_p1), %s1555_s30, 4294966272  ;;  %s20_s9 = sadd.s32 1, %s2176_s9   ;;  %s3399_s20 = sld [smem:[#allocation13_spill]] }
 0x421   : > { %p17_p3 = scmp.ge.s32.totalorder %s20_s9, 34   ;;  %s3400_s21 = sld [smem:[#allocation14_spill]] }
 0x422   : > { %s3401_s13 = sld [smem:[#allocation15_spill]]  ;;  %s3402_s23 = smov %s2144_s26 }
 0x423   : > { %s3403_s24 = smov %s2140_s25  ;;  %s3404_s25 = smov %s2339_s11 }
 0x424   : > { %s3405_s26 = smov %s2148_s27  ;;  %s3406_s27 = smov %s2336_s10 }
 0x425   : > { %s3407_s28 = smov %s2164_s7  ;;  %s3408_s29 = smov %s2168_s5 }
 0x426   : > { %s3409_s30 = smov %s2172_s8  ;;  %s3410_s7 = smov %s3399_s20 }
 0x427   : > { %s3411_s5 = smov %s3400_s21  ;;  %19 = sbr.rel (!%p17_p3) target bundleno = 12 (0xc), region = 149 }
 0x428   : > { %s3412_s8 = smov %s3401_s13 }
 0x42e   :  { %1560 = vsyncpa [#allocation10], 1 }
 0x42f   :  { %1562 = vsyncpa [#allocation10 + $0x1], 1 }

</bundles_post_ra>
